<compile_context>
chip_gen: v7x
topology: tpu7x:2x2x1
jax: 0.10.0
libtpu: 0.0.40
codegen_flags: <defaults>
</compile_context>

<pallas_src>
import functools

import jax
import jax.numpy as jnp
from jax.experimental import pallas as pl
from jax.experimental.pallas import tpu as pltpu


# --------------------------------- kernel ------------------------------------

def _gen_loss_kernel(hr_est_ref, hr_img_ref, dvar0_ref, prev_ref, next_ref,
                     lr_est_ref, lr_img_ref,
                     res_t_ref, part_ref,
                     *, C, H, W, tile_h, strip_last, x_len, y_len):
    """One (batch, H-tile) step: residual_t tile + one (8,128) partials block."""
    t = pl.program_id(1)
    row0 = t * tile_h                       # first global row of this tile
    f32 = jnp.float32

    # hoisted 2-D masks (broadcast against per-channel (tile_h, W) slabs)
    rown = jax.lax.broadcasted_iota(jnp.int32, (tile_h, W), 0)
    coln = jax.lax.broadcasted_iota(jnp.int32, (tile_h, W), 1)
    w_mask = (coln < (W - 1)).astype(f32)   # valid TV pairs along W
    h_mask = (rown >= 1).astype(f32)        # in-tile TV pairs along H

    # ------------- image MSE + TV partial sums (per channel) -------------
    img_sse = 0.0
    tvh = 0.0
    tvw = 0.0
    tvh_b = 0.0
    for c in range(C):
        xc = hr_est_ref[0, c].astype(f32)                       # (tile_h, W)
        yc = hr_img_ref[0, c].astype(f32)
        dc = xc - yc
        img_sse = img_sse + jnp.sum(dc * dc)

        # TV along W: roll(+1 lane) - x, mask out the wrapped last column
        dwc = pltpu.roll(xc, shift=W - 1, axis=1) - xc
        tvw = tvw + jnp.sum(dwc * dwc * w_mask)

        # TV along H, pairs fully inside the tile
        dhc = xc - pltpu.roll(xc, shift=1, axis=0)
        tvh = tvh + jnp.sum(dhc * dhc * h_mask)

        # TV along H, pair straddling the tile boundary (uses halo row)
        prow = prev_ref[0, c, pl.ds(strip_last, 1), :].astype(f32)   # (1, W)
        d0c = xc[0:1, :] - prow
        tvh_b = tvh_b + jnp.sum(d0c * d0c)
    tvh = tvh + jnp.where(t > 0, tvh_b, 0.0)

    # ------------- mass-equation residual (np.gradient style) -------------
    rho = hr_est_ref[0, 0].astype(f32) * 20.0                    # (tile_h, W)
    u = (hr_est_ref[0, 1].astype(f32) + 200.0) * 1500.0
    v = (hr_est_ref[0, 2].astype(f32) + 500.0) * 1500.0
    drho_dt = dvar0_ref[0, 0].astype(f32) * 20.0
    fu = rho * u
    fv = rho * v

    dx = x_len / H            # X_len / rho.shape[2]  (reference quirk)
    dy = y_len / 1.0          # Y_len / rho.shape[1]  (reference quirk)
    inv_dx = 1.0 / dx
    inv_dy = 1.0 / dy

    # dfdx along W (full width lives in the tile)
    nxt = pltpu.roll(fu, shift=W - 1, axis=1)    # nxt[j] = fu[j+1] (wraps at W-1)
    prv = pltpu.roll(fu, shift=1, axis=1)        # prv[j] = fu[j-1] (wraps at 0)
    dfdx = jnp.where(coln == 0, (nxt - fu) * inv_dx,
                     jnp.where(coln == W - 1, (fu - prv) * inv_dx,
                               (nxt - prv) * (0.5 * inv_dx)))

    # dfdy along H; 1-row halos come from the prev / next strips
    f_prev = ((prev_ref[0, 0, pl.ds(strip_last, 1), :].astype(f32) * 20.0) *
              ((prev_ref[0, 2, pl.ds(strip_last, 1), :].astype(f32) + 500.0)
               * 1500.0))                                        # (1, W)
    f_next = ((next_ref[0, 0, pl.ds(0, 1), :].astype(f32) * 20.0) *
              ((next_ref[0, 2, pl.ds(0, 1), :].astype(f32) + 500.0)
               * 1500.0))                                        # (1, W)
    nxt_h = pltpu.roll(fv, shift=tile_h - 1, axis=0)
    prv_h = pltpu.roll(fv, shift=1, axis=0)
    nxt_h = jnp.where(rown == tile_h - 1, f_next, nxt_h)
    prv_h = jnp.where(rown == 0, f_prev, prv_h)
    grow = rown + row0                                           # global row index
    dfdy = jnp.where(grow == 0, (nxt_h - fv) * inv_dy,
                     jnp.where(grow == H - 1, (fv - prv_h) * inv_dy,
                               (nxt_h - prv_h) * (0.5 * inv_dy)))

    residual_t = dfdx + dfdy
    residual = drho_dt - residual_t
    res_t_ref[...] = residual_t[None, None, :, :]
    res_sq = jnp.sum(residual * residual)
    res_max = jnp.max(jnp.abs(residual))

    # ------------- flow-loss SSE (counted once per batch element) -------------
    dl = lr_est_ref[...].astype(f32) - lr_img_ref[...].astype(f32)
    flow_sse = jnp.where(t == 0, jnp.sum(dl * dl), 0.0)

    # ------------- single lane-dense partials store -------------
    rsel = jax.lax.broadcasted_iota(jnp.int32, (8, 128), 0)
    part = (jnp.where(rsel == 0, img_sse, 0.0)
            + jnp.where(rsel == 1, tvh, 0.0)
            + jnp.where(rsel == 2, tvw, 0.0)
            + jnp.where(rsel == 3, res_sq, 0.0)
            + jnp.where(rsel == 4, res_max, 0.0)
            + jnp.where(rsel == 5, flow_sse, 0.0))
    part_ref[...] = part[None, None, :, :]


# --------------------------------- wrapper ------------------------------------

def _choose_tile_h(H, W, C, budget_bytes, max_tile_h=None):
    """Largest sublane-aligned divisor of H whose pipeline footprint fits."""
    if H % 8 != 0:
        return H                                  # cannot tile with aligned strips
    cands = [th for th in range(8, H + 1, 8) if H % th == 0]
    if max_tile_h is not None:
        cands = [th for th in cands if th <= max_tile_h] or [8]

    def footprint(th):
        # hr_est + hr_img + dvar ch0 + residual_t out + 2 halo strips, x2 buffers
        blocks = 4 * W * (2 * C * th + 2 * th + 2 * C * 8)
        interm = 6 * 4 * W * th                   # headroom for f32 intermediates
        return 2 * blocks + interm

    ok = [th for th in cands if footprint(th) <= budget_bytes]
    return max(ok) if ok else min(cands)


def generator_loss_frvsr(out_labels, hr_est, hr_img, lr_est, lr_img, dvar_dt,
                         idx, *, max_tile_h=None, interpret=False):
    """Forward pass of GeneratorLoss_FRVSR.

    `idx` must be a static Python int (the reference also uses a Python-level
    `if idx != 0:`).  Returns (image_loss, adversarial_loss, physics_loss,
    tv_loss, flow_loss, residual_t).
    """
    B, C, H, W = hr_est.shape
    Bl, Cl, hl, wl = lr_est.shape

    # Size tiles from the actual device VMEM (64 MiB/TC on v7x, 128 on v5e/v6e).
    try:
        vmem_cap = int(pltpu.get_tpu_info().vmem_capacity_bytes)
    except Exception:  # conservative fallback (v7x per-TC VMEM)
        vmem_cap = 64 * 1024 * 1024
    budget = int(0.7 * vmem_cap)

    tile_h = _choose_tile_h(H, W, C, budget, max_tile_h)
    n_tiles = H // tile_h
    strip_rows = 8 if H % 8 == 0 else H           # 8-row aligned halo strips
    strip_last = strip_rows - 1
    bpt = tile_h // strip_rows                    # strip blocks per H tile
    n_strips = H // strip_rows

    per_step = (4 * W * (2 * C * tile_h + 2 * tile_h + 2 * C * strip_rows)
                + 2 * 4 * Cl * hl * wl + 4 * 8 * 128)
    vmem_limit = int(min(budget, max(32 * 1024 * 1024,
                                     3 * per_step + (8 << 20))))

    kernel = functools.partial(
        _gen_loss_kernel, C=C, H=H, W=W, tile_h=tile_h,
        strip_last=strip_last, x_len=0.2, y_len=0.4)

    residual_t, partials = pl.pallas_call(
        kernel,
        grid=(B, n_tiles),
        in_specs=[
            pl.BlockSpec((1, C, tile_h, W), lambda b, t: (b, 0, t, 0)),    # hr_est
            pl.BlockSpec((1, C, tile_h, W), lambda b, t: (b, 0, t, 0)),    # hr_img
            pl.BlockSpec((1, 1, tile_h, W), lambda b, t: (b, 0, t, 0)),    # dvar ch0
            pl.BlockSpec((1, C, strip_rows, W),                            # prev halo
                         lambda b, t: (b, 0, jnp.maximum(t * bpt - 1, 0), 0)),
            pl.BlockSpec((1, C, strip_rows, W),                            # next halo
                         lambda b, t: (b, 0,
                                       jnp.minimum((t + 1) * bpt, n_strips - 1), 0)),
            pl.BlockSpec((1, Cl, hl, wl), lambda b, t: (b, 0, 0, 0)),      # lr_est
            pl.BlockSpec((1, Cl, hl, wl), lambda b, t: (b, 0, 0, 0)),      # lr_img
        ],
        out_specs=(
            pl.BlockSpec((1, 1, tile_h, W), lambda b, t: (b, 0, t, 0)),    # residual_t
            pl.BlockSpec((1, 1, 8, 128), lambda b, t: (b, t, 0, 0)),       # partials
        ),
        out_shape=(
            jax.ShapeDtypeStruct((B, 1, H, W), jnp.float32),
            jax.ShapeDtypeStruct((B, n_tiles, 8, 128), jnp.float32),
        ),
        compiler_params=pltpu.CompilerParams(
            dimension_semantics=("parallel", "parallel"),
            vmem_limit_bytes=vmem_limit,
        ),
        interpret=interpret,
    )(hr_est, hr_img, dvar_dt, hr_est, hr_est, lr_est, lr_img)

    # ---------- finish the tiny reductions in plain JAX ----------
    p = partials[:, :, :, 0]                        # (B, n_tiles, 8); lane 0
    img_sse = jnp.sum(p[:, :, 0])
    tvh = jnp.sum(p[:, :, 1])
    tvw = jnp.sum(p[:, :, 2])
    res_sq = jnp.sum(p[:, :, 3])
    r_max = jnp.max(p[:, :, 4])
    flow_sse = jnp.sum(p[:, :, 5])

    image_loss = img_sse / float(B * C * H * W)
    adversarial_loss = -jnp.mean(out_labels.astype(jnp.float32))

    count_h = float(C * (H - 1) * W)
    count_w = float(C * H * (W - 1))
    tv_loss = 2.0 * (tvh / count_h + tvw / count_w) / float(B)

    # == mean((residual / max|residual|)^2); NaN for all-zero residual, as in ref
    physics_loss = (res_sq / float(B * H * W)) / (r_max * r_max)

    if idx != 0:
        flow_loss = flow_sse / float(Bl * Cl * hl * wl)
    else:
        flow_loss = jnp.zeros((1,), jnp.float32)    # matches torch.tensor([0.0])

    return (image_loss, adversarial_loss, physics_loss, tv_loss, flow_loss,
            residual_t)


# ----------------------------- pure-JAX reference -----------------------------

def _reference_forward(out_labels, hr_est, hr_img, lr_est, lr_img, dvar_dt, idx):
    hr_est = hr_est.astype(jnp.float32)
    hr_img = hr_img.astype(jnp.float32)
    B, C, H, W = hr_est.shape

    adversarial = -jnp.mean(out_labels.astype(jnp.float32))
    image = jnp.mean((hr_est - hr_img) ** 2)

    h_tv = jnp.sum((hr_est[:, :, 1:, :] - hr_est[:, :, :-1, :]) ** 2)
    w_tv = jnp.sum((hr_est[:, :, :, 1:] - hr_est[:, :, :, :-1]) ** 2)
    tv = 2.0 * (h_tv / float(C * (H - 1) * W)
                + w_tv / float(C * H * (W - 1))) / float(B)

    rho = hr_est[:, 0] * 20.0
    u = (hr_est[:, 1] + 200.0) * 1500.0
    v = (hr_est[:, 2] + 500.0) * 1500.0
    drho_dt = dvar_dt[:, 0].astype(jnp.float32) * 20.0
    dx = 0.2 / H
    dy = 0.4

    def grad(f, axis, d):
        f = jnp.moveaxis(f, axis, -1)
        left = (f[..., 1:2] - f[..., 0:1]) / d
        right = (f[..., -1:] - f[..., -2:-1]) / d
        mid = (f[..., 2:] - f[..., :-2]) / (2.0 * d)
        return jnp.moveaxis(jnp.concatenate([left, mid, right], axis=-1), -1, axis)

    residual_t = grad(rho * u, -1, dx) + grad(rho * v, -2, dy)
    residual = drho_dt - residual_t
    physics = jnp.mean((residual / jnp.max(jnp.abs(residual))) ** 2)

    if idx != 0:
        flow = jnp.mean((lr_est.astype(jnp.float32)
                         - lr_img.astype(jnp.float32)) ** 2)
    else:
        flow = jnp.zeros((1,), jnp.float32)
    return image, adversarial, physics, tv, flow, residual_t[:, None]


# ----------------------------------- demo -------------------------------------

if __name__ == "__main__":
    import numpy as np

    key = jax.random.PRNGKey(0)
    k1, k2, k3, k4, k5, k6 = jax.random.split(key, 6)

    # mass_eq needs >= 5 channels; H multiple of 8 and W multiple of 128 keep
    # the halo strips / residual_t stores on aligned (8, 128) tiles.
    B, C, H, W = 2, 5, 32, 128
    Cl, hl, wl = 5, 8, 64

    out_labels = jax.random.uniform(k1, (B, 1), jnp.float32)
    hr_est = jax.random.normal(k2, (B, C, H, W), jnp.float32)
    hr_img = jax.random.normal(k3, (B, C, H, W), jnp.float32)
    lr_est = jax.random.normal(k4, (B, Cl, hl, wl), jnp.float32)
    lr_img = jax.random.normal(k5, (B, Cl, hl, wl), jnp.float32)
    dvar_dt = jax.random.normal(k6, (B, C, H, W), jnp.float32)
    idx = 1

    # max_tile_h=8 -> 4 H-tiles per frame, so the halo path is exercised even
    # at this small demo size.
    result = generator_loss_frvsr(out_labels, hr_est, hr_img, lr_est, lr_img,
                                  dvar_dt, idx, max_tile_h=8)
    jax.block_until_ready(result)

    ref = _reference_forward(out_labels, hr_est, hr_img, lr_est, lr_img,
                             dvar_dt, idx)
    names = ("image_loss", "adversarial_loss", "physics_loss", "tv_loss",
             "flow_loss", "residual_t")
    for name, got, want in zip(names, result, ref):
        got = np.asarray(got, dtype=np.float64)
        want = np.asarray(want, dtype=np.float64)
        scale = max(float(np.max(np.abs(want))), 1e-30)
        err = float(np.max(np.abs(got - want))) / scale
        assert err < 1e-3, f"{name}: relative error {err}"

    print("KERNEL_OK")
</pallas_src>

<mosaic_0001>
module attributes {stable_mosaic.version = 11 : i64} {
  func.func @_gen_loss_kernel(%arg0: i32, %arg1: i32, %arg2: memref<1x5x8x128xf32, #tpu.memory_space<vmem>>, %arg3: memref<1x5x8x128xf32, #tpu.memory_space<vmem>>, %arg4: memref<1x1x8x128xf32, #tpu.memory_space<vmem>>, %arg5: memref<1x5x8x128xf32, #tpu.memory_space<vmem>>, %arg6: memref<1x5x8x128xf32, #tpu.memory_space<vmem>>, %arg7: memref<1x5x8x64xf32, #tpu.memory_space<vmem>>, %arg8: memref<1x5x8x64xf32, #tpu.memory_space<vmem>>, %arg9: memref<1x1x8x128xf32, #tpu.memory_space<vmem>>, %arg10: memref<1x1x8x128xf32, #tpu.memory_space<vmem>>) attributes {dimension_semantics = [#tpu.dimension_semantics<parallel>, #tpu.dimension_semantics<parallel>], iteration_bounds = array<i64: 2, 4>, scalar_prefetch = 0 : i64, scratch_operands = 0 : i64, tpu.core_type = #tpu.core_type<tc>, window_params = [{transform_indices = @transform_0, window_bounds = array<i64: 1, 5, 8, 128>}, {transform_indices = @transform_1, window_bounds = array<i64: 1, 5, 8, 128>}, {transform_indices = @transform_2, window_bounds = array<i64: 1, 1, 8, 128>}, {transform_indices = @transform_3, window_bounds = array<i64: 1, 5, 8, 128>}, {transform_indices = @transform_4, window_bounds = array<i64: 1, 5, 8, 128>}, {transform_indices = @transform_5, window_bounds = array<i64: 1, 5, 8, 64>}, {transform_indices = @transform_6, window_bounds = array<i64: 1, 5, 8, 64>}, {transform_indices = @transform_7, window_bounds = array<i64: 1, 1, 8, 128>}, {transform_indices = @transform_8, window_bounds = array<i64: 1, 1, 8, 128>}]} {
    %c8_i32 = arith.constant 8 : i32
    %0 = arith.muli %arg1, %c8_i32 : i32
    %1 = tpu.iota {dimensions = array<i32: 0>} : vector<8x128xi32>
    %2 = tpu.iota {dimensions = array<i32: 1>} : vector<8x128xi32>
    %c127_i32 = arith.constant 127 : i32
    %3 = vector.broadcast %c127_i32 : i32 to vector<8x128xi32>
    %4 = arith.cmpi slt, %2, %3 : vector<8x128xi32>
    %5 = arith.extui %4 : vector<8x128xi1> to vector<8x128xi32>
    %6 = arith.sitofp %5 : vector<8x128xi32> to vector<8x128xf32>
    %c1_i32 = arith.constant 1 : i32
    %7 = vector.broadcast %c1_i32 : i32 to vector<8x128xi32>
    %8 = arith.cmpi sge, %1, %7 : vector<8x128xi32>
    %9 = arith.extui %8 : vector<8x128xi1> to vector<8x128xi32>
    %10 = arith.sitofp %9 : vector<8x128xi32> to vector<8x128xf32>
    %c0 = arith.constant 0 : index
    %c0_0 = arith.constant 0 : index
    %c0_1 = arith.constant 0 : index
    %c0_2 = arith.constant 0 : index
    %11 = vector.load %arg2[%c0, %c0_0, %c0_1, %c0_2] : memref<1x5x8x128xf32, #tpu.memory_space<vmem>>, vector<1x1x8x128xf32>
    %12 = vector.shape_cast %11 : vector<1x1x8x128xf32> to vector<8x128xf32>
    %c0_3 = arith.constant 0 : index
    %c0_4 = arith.constant 0 : index
    %c0_5 = arith.constant 0 : index
    %c0_6 = arith.constant 0 : index
    %13 = vector.load %arg3[%c0_3, %c0_4, %c0_5, %c0_6] : memref<1x5x8x128xf32, #tpu.memory_space<vmem>>, vector<1x1x8x128xf32>
    %14 = vector.shape_cast %13 : vector<1x1x8x128xf32> to vector<8x128xf32>
    %15 = arith.subf %12, %14 : vector<8x128xf32>
    %16 = arith.mulf %15, %15 : vector<8x128xf32>
    %17 = vector.shape_cast %16 : vector<8x128xf32> to vector<1x8x128xf32>
    %cst = arith.constant dense<0.000000e+00> : vector<1xf32>
    %18 = vector.multi_reduction <add>, %17, %cst [1, 2] : vector<1x8x128xf32> to vector<1xf32>
    %19 = vector.shape_cast %18 : vector<1xf32> to vector<1x1x1xf32>
    %20 = vector.extract %19[0, 0, 0] : f32 from vector<1x1x1xf32>
    %cst_7 = arith.constant 0.000000e+00 : f32
    %21 = arith.addf %cst_7, %20 : f32
    %c127_i32_8 = arith.constant 127 : i32
    %22 = tpu.dynamic_rotate %12 by %c127_i32_8 dim 1 : vector<8x128xf32>, i32 -> vector<8x128xf32>
    %23 = arith.subf %22, %12 : vector<8x128xf32>
    %24 = arith.mulf %23, %23 : vector<8x128xf32>
    %25 = arith.mulf %24, %6 : vector<8x128xf32>
    %26 = vector.shape_cast %25 : vector<8x128xf32> to vector<1x8x128xf32>
    %cst_9 = arith.constant dense<0.000000e+00> : vector<1xf32>
    %27 = vector.multi_reduction <add>, %26, %cst_9 [1, 2] : vector<1x8x128xf32> to vector<1xf32>
    %28 = vector.shape_cast %27 : vector<1xf32> to vector<1x1x1xf32>
    %29 = vector.extract %28[0, 0, 0] : f32 from vector<1x1x1xf32>
    %cst_10 = arith.constant 0.000000e+00 : f32
    %30 = arith.addf %cst_10, %29 : f32
    %c1_i32_11 = arith.constant 1 : i32
    %31 = tpu.dynamic_rotate %12 by %c1_i32_11 dim 0 : vector<8x128xf32>, i32 -> vector<8x128xf32>
    %32 = arith.subf %12, %31 : vector<8x128xf32>
    %33 = arith.mulf %32, %32 : vector<8x128xf32>
    %34 = arith.mulf %33, %10 : vector<8x128xf32>
    %35 = vector.shape_cast %34 : vector<8x128xf32> to vector<1x8x128xf32>
    %cst_12 = arith.constant dense<0.000000e+00> : vector<1xf32>
    %36 = vector.multi_reduction <add>, %35, %cst_12 [1, 2] : vector<1x8x128xf32> to vector<1xf32>
    %37 = vector.shape_cast %36 : vector<1xf32> to vector<1x1x1xf32>
    %38 = vector.extract %37[0, 0, 0] : f32 from vector<1x1x1xf32>
    %cst_13 = arith.constant 0.000000e+00 : f32
    %39 = arith.addf %cst_13, %38 : f32
    %c0_14 = arith.constant 0 : index
    %c0_15 = arith.constant 0 : index
    %c7 = arith.constant 7 : index
    %c0_16 = arith.constant 0 : index
    %40 = vector.load %arg5[%c0_14, %c0_15, %c7, %c0_16] : memref<1x5x8x128xf32, #tpu.memory_space<vmem>>, vector<1x1x1x128xf32>
    %41 = vector.shape_cast %40 : vector<1x1x1x128xf32> to vector<1x128xf32>
    %42 = vector.extract_strided_slice %12 {offsets = [0, 0], sizes = [1, 128], strides = [1, 1]} : vector<8x128xf32> to vector<1x128xf32>
    %43 = arith.subf %42, %41 : vector<1x128xf32>
    %44 = arith.mulf %43, %43 : vector<1x128xf32>
    %45 = vector.shape_cast %44 : vector<1x128xf32> to vector<1x1x128xf32>
    %cst_17 = arith.constant dense<0.000000e+00> : vector<1xf32>
    %46 = vector.multi_reduction <add>, %45, %cst_17 [1, 2] : vector<1x1x128xf32> to vector<1xf32>
    %47 = vector.shape_cast %46 : vector<1xf32> to vector<1x1x1xf32>
    %48 = vector.extract %47[0, 0, 0] : f32 from vector<1x1x1xf32>
    %cst_18 = arith.constant 0.000000e+00 : f32
    %49 = arith.addf %cst_18, %48 : f32
    %c0_19 = arith.constant 0 : index
    %c1 = arith.constant 1 : index
    %c0_20 = arith.constant 0 : index
    %c0_21 = arith.constant 0 : index
    %50 = vector.load %arg2[%c0_19, %c1, %c0_20, %c0_21] : memref<1x5x8x128xf32, #tpu.memory_space<vmem>>, vector<1x1x8x128xf32>
    %51 = vector.shape_cast %50 : vector<1x1x8x128xf32> to vector<8x128xf32>
    %c0_22 = arith.constant 0 : index
    %c1_23 = arith.constant 1 : index
    %c0_24 = arith.constant 0 : index
    %c0_25 = arith.constant 0 : index
    %52 = vector.load %arg3[%c0_22, %c1_23, %c0_24, %c0_25] : memref<1x5x8x128xf32, #tpu.memory_space<vmem>>, vector<1x1x8x128xf32>
    %53 = vector.shape_cast %52 : vector<1x1x8x128xf32> to vector<8x128xf32>
    %54 = arith.subf %51, %53 : vector<8x128xf32>
    %55 = arith.mulf %54, %54 : vector<8x128xf32>
    %56 = vector.shape_cast %55 : vector<8x128xf32> to vector<1x8x128xf32>
    %cst_26 = arith.constant dense<0.000000e+00> : vector<1xf32>
    %57 = vector.multi_reduction <add>, %56, %cst_26 [1, 2] : vector<1x8x128xf32> to vector<1xf32>
    %58 = vector.shape_cast %57 : vector<1xf32> to vector<1x1x1xf32>
    %59 = vector.extract %58[0, 0, 0] : f32 from vector<1x1x1xf32>
    %60 = arith.addf %21, %59 : f32
    %c127_i32_27 = arith.constant 127 : i32
    %61 = tpu.dynamic_rotate %51 by %c127_i32_27 dim 1 : vector<8x128xf32>, i32 -> vector<8x128xf32>
    %62 = arith.subf %61, %51 : vector<8x128xf32>
    %63 = arith.mulf %62, %62 : vector<8x128xf32>
    %64 = arith.mulf %63, %6 : vector<8x128xf32>
    %65 = vector.shape_cast %64 : vector<8x128xf32> to vector<1x8x128xf32>
    %cst_28 = arith.constant dense<0.000000e+00> : vector<1xf32>
    %66 = vector.multi_reduction <add>, %65, %cst_28 [1, 2] : vector<1x8x128xf32> to vector<1xf32>
    %67 = vector.shape_cast %66 : vector<1xf32> to vector<1x1x1xf32>
    %68 = vector.extract %67[0, 0, 0] : f32 from vector<1x1x1xf32>
    %69 = arith.addf %30, %68 : f32
    %c1_i32_29 = arith.constant 1 : i32
    %70 = tpu.dynamic_rotate %51 by %c1_i32_29 dim 0 : vector<8x128xf32>, i32 -> vector<8x128xf32>
    %71 = arith.subf %51, %70 : vector<8x128xf32>
    %72 = arith.mulf %71, %71 : vector<8x128xf32>
    %73 = arith.mulf %72, %10 : vector<8x128xf32>
    %74 = vector.shape_cast %73 : vector<8x128xf32> to vector<1x8x128xf32>
    %cst_30 = arith.constant dense<0.000000e+00> : vector<1xf32>
    %75 = vector.multi_reduction <add>, %74, %cst_30 [1, 2] : vector<1x8x128xf32> to vector<1xf32>
    %76 = vector.shape_cast %75 : vector<1xf32> to vector<1x1x1xf32>
    %77 = vector.extract %76[0, 0, 0] : f32 from vector<1x1x1xf32>
    %78 = arith.addf %39, %77 : f32
    %c0_31 = arith.constant 0 : index
    %c1_32 = arith.constant 1 : index
    %c7_33 = arith.constant 7 : index
    %c0_34 = arith.constant 0 : index
    %79 = vector.load %arg5[%c0_31, %c1_32, %c7_33, %c0_34] : memref<1x5x8x128xf32, #tpu.memory_space<vmem>>, vector<1x1x1x128xf32>
    %80 = vector.shape_cast %79 : vector<1x1x1x128xf32> to vector<1x128xf32>
    %81 = vector.extract_strided_slice %51 {offsets = [0, 0], sizes = [1, 128], strides = [1, 1]} : vector<8x128xf32> to vector<1x128xf32>
    %82 = arith.subf %81, %80 : vector<1x128xf32>
    %83 = arith.mulf %82, %82 : vector<1x128xf32>
    %84 = vector.shape_cast %83 : vector<1x128xf32> to vector<1x1x128xf32>
    %cst_35 = arith.constant dense<0.000000e+00> : vector<1xf32>
    %85 = vector.multi_reduction <add>, %84, %cst_35 [1, 2] : vector<1x1x128xf32> to vector<1xf32>
    %86 = vector.shape_cast %85 : vector<1xf32> to vector<1x1x1xf32>
    %87 = vector.extract %86[0, 0, 0] : f32 from vector<1x1x1xf32>
    %88 = arith.addf %49, %87 : f32
    %c0_36 = arith.constant 0 : index
    %c2 = arith.constant 2 : index
    %c0_37 = arith.constant 0 : index
    %c0_38 = arith.constant 0 : index
    %89 = vector.load %arg2[%c0_36, %c2, %c0_37, %c0_38] : memref<1x5x8x128xf32, #tpu.memory_space<vmem>>, vector<1x1x8x128xf32>
    %90 = vector.shape_cast %89 : vector<1x1x8x128xf32> to vector<8x128xf32>
    %c0_39 = arith.constant 0 : index
    %c2_40 = arith.constant 2 : index
    %c0_41 = arith.constant 0 : index
    %c0_42 = arith.constant 0 : index
    %91 = vector.load %arg3[%c0_39, %c2_40, %c0_41, %c0_42] : memref<1x5x8x128xf32, #tpu.memory_space<vmem>>, vector<1x1x8x128xf32>
    %92 = vector.shape_cast %91 : vector<1x1x8x128xf32> to vector<8x128xf32>
    %93 = arith.subf %90, %92 : vector<8x128xf32>
    %94 = arith.mulf %93, %93 : vector<8x128xf32>
    %95 = vector.shape_cast %94 : vector<8x128xf32> to vector<1x8x128xf32>
    %cst_43 = arith.constant dense<0.000000e+00> : vector<1xf32>
    %96 = vector.multi_reduction <add>, %95, %cst_43 [1, 2] : vector<1x8x128xf32> to vector<1xf32>
    %97 = vector.shape_cast %96 : vector<1xf32> to vector<1x1x1xf32>
    %98 = vector.extract %97[0, 0, 0] : f32 from vector<1x1x1xf32>
    %99 = arith.addf %60, %98 : f32
    %c127_i32_44 = arith.constant 127 : i32
    %100 = tpu.dynamic_rotate %90 by %c127_i32_44 dim 1 : vector<8x128xf32>, i32 -> vector<8x128xf32>
    %101 = arith.subf %100, %90 : vector<8x128xf32>
    %102 = arith.mulf %101, %101 : vector<8x128xf32>
    %103 = arith.mulf %102, %6 : vector<8x128xf32>
    %104 = vector.shape_cast %103 : vector<8x128xf32> to vector<1x8x128xf32>
    %cst_45 = arith.constant dense<0.000000e+00> : vector<1xf32>
    %105 = vector.multi_reduction <add>, %104, %cst_45 [1, 2] : vector<1x8x128xf32> to vector<1xf32>
    %106 = vector.shape_cast %105 : vector<1xf32> to vector<1x1x1xf32>
    %107 = vector.extract %106[0, 0, 0] : f32 from vector<1x1x1xf32>
    %108 = arith.addf %69, %107 : f32
    %c1_i32_46 = arith.constant 1 : i32
    %109 = tpu.dynamic_rotate %90 by %c1_i32_46 dim 0 : vector<8x128xf32>, i32 -> vector<8x128xf32>
    %110 = arith.subf %90, %109 : vector<8x128xf32>
    %111 = arith.mulf %110, %110 : vector<8x128xf32>
    %112 = arith.mulf %111, %10 : vector<8x128xf32>
    %113 = vector.shape_cast %112 : vector<8x128xf32> to vector<1x8x128xf32>
    %cst_47 = arith.constant dense<0.000000e+00> : vector<1xf32>
    %114 = vector.multi_reduction <add>, %113, %cst_47 [1, 2] : vector<1x8x128xf32> to vector<1xf32>
    %115 = vector.shape_cast %114 : vector<1xf32> to vector<1x1x1xf32>
    %116 = vector.extract %115[0, 0, 0] : f32 from vector<1x1x1xf32>
    %117 = arith.addf %78, %116 : f32
    %c0_48 = arith.constant 0 : index
    %c2_49 = arith.constant 2 : index
    %c7_50 = arith.constant 7 : index
    %c0_51 = arith.constant 0 : index
    %118 = vector.load %arg5[%c0_48, %c2_49, %c7_50, %c0_51] : memref<1x5x8x128xf32, #tpu.memory_space<vmem>>, vector<1x1x1x128xf32>
    %119 = vector.shape_cast %118 : vector<1x1x1x128xf32> to vector<1x128xf32>
    %120 = vector.extract_strided_slice %90 {offsets = [0, 0], sizes = [1, 128], strides = [1, 1]} : vector<8x128xf32> to vector<1x128xf32>
    %121 = arith.subf %120, %119 : vector<1x128xf32>
    %122 = arith.mulf %121, %121 : vector<1x128xf32>
    %123 = vector.shape_cast %122 : vector<1x128xf32> to vector<1x1x128xf32>
    %cst_52 = arith.constant dense<0.000000e+00> : vector<1xf32>
    %124 = vector.multi_reduction <add>, %123, %cst_52 [1, 2] : vector<1x1x128xf32> to vector<1xf32>
    %125 = vector.shape_cast %124 : vector<1xf32> to vector<1x1x1xf32>
    %126 = vector.extract %125[0, 0, 0] : f32 from vector<1x1x1xf32>
    %127 = arith.addf %88, %126 : f32
    %c0_53 = arith.constant 0 : index
    %c3 = arith.constant 3 : index
    %c0_54 = arith.constant 0 : index
    %c0_55 = arith.constant 0 : index
    %128 = vector.load %arg2[%c0_53, %c3, %c0_54, %c0_55] : memref<1x5x8x128xf32, #tpu.memory_space<vmem>>, vector<1x1x8x128xf32>
    %129 = vector.shape_cast %128 : vector<1x1x8x128xf32> to vector<8x128xf32>
    %c0_56 = arith.constant 0 : index
    %c3_57 = arith.constant 3 : index
    %c0_58 = arith.constant 0 : index
    %c0_59 = arith.constant 0 : index
    %130 = vector.load %arg3[%c0_56, %c3_57, %c0_58, %c0_59] : memref<1x5x8x128xf32, #tpu.memory_space<vmem>>, vector<1x1x8x128xf32>
    %131 = vector.shape_cast %130 : vector<1x1x8x128xf32> to vector<8x128xf32>
    %132 = arith.subf %129, %131 : vector<8x128xf32>
    %133 = arith.mulf %132, %132 : vector<8x128xf32>
    %134 = vector.shape_cast %133 : vector<8x128xf32> to vector<1x8x128xf32>
    %cst_60 = arith.constant dense<0.000000e+00> : vector<1xf32>
    %135 = vector.multi_reduction <add>, %134, %cst_60 [1, 2] : vector<1x8x128xf32> to vector<1xf32>
    %136 = vector.shape_cast %135 : vector<1xf32> to vector<1x1x1xf32>
    %137 = vector.extract %136[0, 0, 0] : f32 from vector<1x1x1xf32>
    %138 = arith.addf %99, %137 : f32
    %c127_i32_61 = arith.constant 127 : i32
    %139 = tpu.dynamic_rotate %129 by %c127_i32_61 dim 1 : vector<8x128xf32>, i32 -> vector<8x128xf32>
    %140 = arith.subf %139, %129 : vector<8x128xf32>
    %141 = arith.mulf %140, %140 : vector<8x128xf32>
    %142 = arith.mulf %141, %6 : vector<8x128xf32>
    %143 = vector.shape_cast %142 : vector<8x128xf32> to vector<1x8x128xf32>
    %cst_62 = arith.constant dense<0.000000e+00> : vector<1xf32>
    %144 = vector.multi_reduction <add>, %143, %cst_62 [1, 2] : vector<1x8x128xf32> to vector<1xf32>
    %145 = vector.shape_cast %144 : vector<1xf32> to vector<1x1x1xf32>
    %146 = vector.extract %145[0, 0, 0] : f32 from vector<1x1x1xf32>
    %147 = arith.addf %108, %146 : f32
    %c1_i32_63 = arith.constant 1 : i32
    %148 = tpu.dynamic_rotate %129 by %c1_i32_63 dim 0 : vector<8x128xf32>, i32 -> vector<8x128xf32>
    %149 = arith.subf %129, %148 : vector<8x128xf32>
    %150 = arith.mulf %149, %149 : vector<8x128xf32>
    %151 = arith.mulf %150, %10 : vector<8x128xf32>
    %152 = vector.shape_cast %151 : vector<8x128xf32> to vector<1x8x128xf32>
    %cst_64 = arith.constant dense<0.000000e+00> : vector<1xf32>
    %153 = vector.multi_reduction <add>, %152, %cst_64 [1, 2] : vector<1x8x128xf32> to vector<1xf32>
    %154 = vector.shape_cast %153 : vector<1xf32> to vector<1x1x1xf32>
    %155 = vector.extract %154[0, 0, 0] : f32 from vector<1x1x1xf32>
    %156 = arith.addf %117, %155 : f32
    %c0_65 = arith.constant 0 : index
    %c3_66 = arith.constant 3 : index
    %c7_67 = arith.constant 7 : index
    %c0_68 = arith.constant 0 : index
    %157 = vector.load %arg5[%c0_65, %c3_66, %c7_67, %c0_68] : memref<1x5x8x128xf32, #tpu.memory_space<vmem>>, vector<1x1x1x128xf32>
    %158 = vector.shape_cast %157 : vector<1x1x1x128xf32> to vector<1x128xf32>
    %159 = vector.extract_strided_slice %129 {offsets = [0, 0], sizes = [1, 128], strides = [1, 1]} : vector<8x128xf32> to vector<1x128xf32>
    %160 = arith.subf %159, %158 : vector<1x128xf32>
    %161 = arith.mulf %160, %160 : vector<1x128xf32>
    %162 = vector.shape_cast %161 : vector<1x128xf32> to vector<1x1x128xf32>
    %cst_69 = arith.constant dense<0.000000e+00> : vector<1xf32>
    %163 = vector.multi_reduction <add>, %162, %cst_69 [1, 2] : vector<1x1x128xf32> to vector<1xf32>
    %164 = vector.shape_cast %163 : vector<1xf32> to vector<1x1x1xf32>
    %165 = vector.extract %164[0, 0, 0] : f32 from vector<1x1x1xf32>
    %166 = arith.addf %127, %165 : f32
    %c0_70 = arith.constant 0 : index
    %c4 = arith.constant 4 : index
    %c0_71 = arith.constant 0 : index
    %c0_72 = arith.constant 0 : index
    %167 = vector.load %arg2[%c0_70, %c4, %c0_71, %c0_72] : memref<1x5x8x128xf32, #tpu.memory_space<vmem>>, vector<1x1x8x128xf32>
    %168 = vector.shape_cast %167 : vector<1x1x8x128xf32> to vector<8x128xf32>
    %c0_73 = arith.constant 0 : index
    %c4_74 = arith.constant 4 : index
    %c0_75 = arith.constant 0 : index
    %c0_76 = arith.constant 0 : index
    %169 = vector.load %arg3[%c0_73, %c4_74, %c0_75, %c0_76] : memref<1x5x8x128xf32, #tpu.memory_space<vmem>>, vector<1x1x8x128xf32>
    %170 = vector.shape_cast %169 : vector<1x1x8x128xf32> to vector<8x128xf32>
    %171 = arith.subf %168, %170 : vector<8x128xf32>
    %172 = arith.mulf %171, %171 : vector<8x128xf32>
    %173 = vector.shape_cast %172 : vector<8x128xf32> to vector<1x8x128xf32>
    %cst_77 = arith.constant dense<0.000000e+00> : vector<1xf32>
    %174 = vector.multi_reduction <add>, %173, %cst_77 [1, 2] : vector<1x8x128xf32> to vector<1xf32>
    %175 = vector.shape_cast %174 : vector<1xf32> to vector<1x1x1xf32>
    %176 = vector.extract %175[0, 0, 0] : f32 from vector<1x1x1xf32>
    %177 = arith.addf %138, %176 : f32
    %c127_i32_78 = arith.constant 127 : i32
    %178 = tpu.dynamic_rotate %168 by %c127_i32_78 dim 1 : vector<8x128xf32>, i32 -> vector<8x128xf32>
    %179 = arith.subf %178, %168 : vector<8x128xf32>
    %180 = arith.mulf %179, %179 : vector<8x128xf32>
    %181 = arith.mulf %180, %6 : vector<8x128xf32>
    %182 = vector.shape_cast %181 : vector<8x128xf32> to vector<1x8x128xf32>
    %cst_79 = arith.constant dense<0.000000e+00> : vector<1xf32>
    %183 = vector.multi_reduction <add>, %182, %cst_79 [1, 2] : vector<1x8x128xf32> to vector<1xf32>
    %184 = vector.shape_cast %183 : vector<1xf32> to vector<1x1x1xf32>
    %185 = vector.extract %184[0, 0, 0] : f32 from vector<1x1x1xf32>
    %186 = arith.addf %147, %185 : f32
    %c1_i32_80 = arith.constant 1 : i32
    %187 = tpu.dynamic_rotate %168 by %c1_i32_80 dim 0 : vector<8x128xf32>, i32 -> vector<8x128xf32>
    %188 = arith.subf %168, %187 : vector<8x128xf32>
    %189 = arith.mulf %188, %188 : vector<8x128xf32>
    %190 = arith.mulf %189, %10 : vector<8x128xf32>
    %191 = vector.shape_cast %190 : vector<8x128xf32> to vector<1x8x128xf32>
    %cst_81 = arith.constant dense<0.000000e+00> : vector<1xf32>
    %192 = vector.multi_reduction <add>, %191, %cst_81 [1, 2] : vector<1x8x128xf32> to vector<1xf32>
    %193 = vector.shape_cast %192 : vector<1xf32> to vector<1x1x1xf32>
    %194 = vector.extract %193[0, 0, 0] : f32 from vector<1x1x1xf32>
    %195 = arith.addf %156, %194 : f32
    %c0_82 = arith.constant 0 : index
    %c4_83 = arith.constant 4 : index
    %c7_84 = arith.constant 7 : index
    %c0_85 = arith.constant 0 : index
    %196 = vector.load %arg5[%c0_82, %c4_83, %c7_84, %c0_85] : memref<1x5x8x128xf32, #tpu.memory_space<vmem>>, vector<1x1x1x128xf32>
    %197 = vector.shape_cast %196 : vector<1x1x1x128xf32> to vector<1x128xf32>
    %198 = vector.extract_strided_slice %168 {offsets = [0, 0], sizes = [1, 128], strides = [1, 1]} : vector<8x128xf32> to vector<1x128xf32>
    %199 = arith.subf %198, %197 : vector<1x128xf32>
    %200 = arith.mulf %199, %199 : vector<1x128xf32>
    %201 = vector.shape_cast %200 : vector<1x128xf32> to vector<1x1x128xf32>
    %cst_86 = arith.constant dense<0.000000e+00> : vector<1xf32>
    %202 = vector.multi_reduction <add>, %201, %cst_86 [1, 2] : vector<1x1x128xf32> to vector<1xf32>
    %203 = vector.shape_cast %202 : vector<1xf32> to vector<1x1x1xf32>
    %204 = vector.extract %203[0, 0, 0] : f32 from vector<1x1x1xf32>
    %205 = arith.addf %166, %204 : f32
    %c0_i32 = arith.constant 0 : i32
    %206 = arith.cmpi sgt, %arg1, %c0_i32 : i32
    %cst_87 = arith.constant 0.000000e+00 : f32
    %207 = arith.select %206, %205, %cst_87 : f32
    %208 = arith.addf %195, %207 : f32
    %c0_88 = arith.constant 0 : index
    %c0_89 = arith.constant 0 : index
    %c0_90 = arith.constant 0 : index
    %c0_91 = arith.constant 0 : index
    %209 = vector.load %arg2[%c0_88, %c0_89, %c0_90, %c0_91] : memref<1x5x8x128xf32, #tpu.memory_space<vmem>>, vector<1x1x8x128xf32>
    %210 = vector.shape_cast %209 : vector<1x1x8x128xf32> to vector<8x128xf32>
    %cst_92 = arith.constant 2.000000e+01 : f32
    %211 = vector.broadcast %cst_92 : f32 to vector<8x128xf32>
    %212 = arith.mulf %210, %211 : vector<8x128xf32>
    %c0_93 = arith.constant 0 : index
    %c1_94 = arith.constant 1 : index
    %c0_95 = arith.constant 0 : index
    %c0_96 = arith.constant 0 : index
    %213 = vector.load %arg2[%c0_93, %c1_94, %c0_95, %c0_96] : memref<1x5x8x128xf32, #tpu.memory_space<vmem>>, vector<1x1x8x128xf32>
    %214 = vector.shape_cast %213 : vector<1x1x8x128xf32> to vector<8x128xf32>
    %cst_97 = arith.constant 2.000000e+02 : f32
    %215 = vector.broadcast %cst_97 : f32 to vector<8x128xf32>
    %216 = arith.addf %214, %215 : vector<8x128xf32>
    %cst_98 = arith.constant 1.500000e+03 : f32
    %217 = vector.broadcast %cst_98 : f32 to vector<8x128xf32>
    %218 = arith.mulf %216, %217 : vector<8x128xf32>
    %c0_99 = arith.constant 0 : index
    %c2_100 = arith.constant 2 : index
    %c0_101 = arith.constant 0 : index
    %c0_102 = arith.constant 0 : index
    %219 = vector.load %arg2[%c0_99, %c2_100, %c0_101, %c0_102] : memref<1x5x8x128xf32, #tpu.memory_space<vmem>>, vector<1x1x8x128xf32>
    %220 = vector.shape_cast %219 : vector<1x1x8x128xf32> to vector<8x128xf32>
    %cst_103 = arith.constant 5.000000e+02 : f32
    %221 = vector.broadcast %cst_103 : f32 to vector<8x128xf32>
    %222 = arith.addf %220, %221 : vector<8x128xf32>
    %cst_104 = arith.constant 1.500000e+03 : f32
    %223 = vector.broadcast %cst_104 : f32 to vector<8x128xf32>
    %224 = arith.mulf %222, %223 : vector<8x128xf32>
    %c0_105 = arith.constant 0 : index
    %c0_106 = arith.constant 0 : index
    %c0_107 = arith.constant 0 : index
    %c0_108 = arith.constant 0 : index
    %225 = vector.load %arg4[%c0_105, %c0_106, %c0_107, %c0_108] : memref<1x1x8x128xf32, #tpu.memory_space<vmem>>, vector<1x1x8x128xf32>
    %226 = vector.shape_cast %225 : vector<1x1x8x128xf32> to vector<8x128xf32>
    %cst_109 = arith.constant 2.000000e+01 : f32
    %227 = vector.broadcast %cst_109 : f32 to vector<8x128xf32>
    %228 = arith.mulf %226, %227 : vector<8x128xf32>
    %229 = arith.mulf %212, %218 : vector<8x128xf32>
    %230 = arith.mulf %212, %224 : vector<8x128xf32>
    %c127_i32_110 = arith.constant 127 : i32
    %231 = tpu.dynamic_rotate %229 by %c127_i32_110 dim 1 : vector<8x128xf32>, i32 -> vector<8x128xf32>
    %c1_i32_111 = arith.constant 1 : i32
    %232 = tpu.dynamic_rotate %229 by %c1_i32_111 dim 1 : vector<8x128xf32>, i32 -> vector<8x128xf32>
    %c0_i32_112 = arith.constant 0 : i32
    %233 = vector.broadcast %c0_i32_112 : i32 to vector<8x128xi32>
    %234 = arith.cmpi eq, %2, %233 : vector<8x128xi32>
    %235 = arith.subf %231, %229 : vector<8x128xf32>
    %cst_113 = arith.constant 1.600000e+02 : f32
    %236 = vector.broadcast %cst_113 : f32 to vector<8x128xf32>
    %237 = arith.mulf %235, %236 : vector<8x128xf32>
    %c127_i32_114 = arith.constant 127 : i32
    %238 = vector.broadcast %c127_i32_114 : i32 to vector<8x128xi32>
    %239 = arith.cmpi eq, %2, %238 : vector<8x128xi32>
    %240 = arith.subf %229, %232 : vector<8x128xf32>
    %cst_115 = arith.constant 1.600000e+02 : f32
    %241 = vector.broadcast %cst_115 : f32 to vector<8x128xf32>
    %242 = arith.mulf %240, %241 : vector<8x128xf32>
    %243 = arith.subf %231, %232 : vector<8x128xf32>
    %cst_116 = arith.constant 8.000000e+01 : f32
    %244 = vector.broadcast %cst_116 : f32 to vector<8x128xf32>
    %245 = arith.mulf %243, %244 : vector<8x128xf32>
    %246 = arith.select %239, %242, %245 : vector<8x128xi1>, vector<8x128xf32>
    %247 = arith.select %234, %237, %246 : vector<8x128xi1>, vector<8x128xf32>
    %c0_117 = arith.constant 0 : index
    %c0_118 = arith.constant 0 : index
    %c7_119 = arith.constant 7 : index
    %c0_120 = arith.constant 0 : index
    %248 = vector.load %arg5[%c0_117, %c0_118, %c7_119, %c0_120] : memref<1x5x8x128xf32, #tpu.memory_space<vmem>>, vector<1x1x1x128xf32>
    %249 = vector.shape_cast %248 : vector<1x1x1x128xf32> to vector<1x128xf32>
    %cst_121 = arith.constant 2.000000e+01 : f32
    %250 = vector.broadcast %cst_121 : f32 to vector<1x128xf32>
    %251 = arith.mulf %249, %250 : vector<1x128xf32>
    %c0_122 = arith.constant 0 : index
    %c2_123 = arith.constant 2 : index
    %c7_124 = arith.constant 7 : index
    %c0_125 = arith.constant 0 : index
    %252 = vector.load %arg5[%c0_122, %c2_123, %c7_124, %c0_125] : memref<1x5x8x128xf32, #tpu.memory_space<vmem>>, vector<1x1x1x128xf32>
    %253 = vector.shape_cast %252 : vector<1x1x1x128xf32> to vector<1x128xf32>
    %cst_126 = arith.constant 5.000000e+02 : f32
    %254 = vector.broadcast %cst_126 : f32 to vector<1x128xf32>
    %255 = arith.addf %253, %254 : vector<1x128xf32>
    %cst_127 = arith.constant 1.500000e+03 : f32
    %256 = vector.broadcast %cst_127 : f32 to vector<1x128xf32>
    %257 = arith.mulf %255, %256 : vector<1x128xf32>
    %258 = arith.mulf %251, %257 : vector<1x128xf32>
    %c0_128 = arith.constant 0 : index
    %c0_129 = arith.constant 0 : index
    %c0_130 = arith.constant 0 : index
    %c0_131 = arith.constant 0 : index
    %259 = vector.load %arg6[%c0_128, %c0_129, %c0_130, %c0_131] : memref<1x5x8x128xf32, #tpu.memory_space<vmem>>, vector<1x1x1x128xf32>
    %260 = vector.shape_cast %259 : vector<1x1x1x128xf32> to vector<1x128xf32>
    %cst_132 = arith.constant 2.000000e+01 : f32
    %261 = vector.broadcast %cst_132 : f32 to vector<1x128xf32>
    %262 = arith.mulf %260, %261 : vector<1x128xf32>
    %c0_133 = arith.constant 0 : index
    %c2_134 = arith.constant 2 : index
    %c0_135 = arith.constant 0 : index
    %c0_136 = arith.constant 0 : index
    %263 = vector.load %arg6[%c0_133, %c2_134, %c0_135, %c0_136] : memref<1x5x8x128xf32, #tpu.memory_space<vmem>>, vector<1x1x1x128xf32>
    %264 = vector.shape_cast %263 : vector<1x1x1x128xf32> to vector<1x128xf32>
    %cst_137 = arith.constant 5.000000e+02 : f32
    %265 = vector.broadcast %cst_137 : f32 to vector<1x128xf32>
    %266 = arith.addf %264, %265 : vector<1x128xf32>
    %cst_138 = arith.constant 1.500000e+03 : f32
    %267 = vector.broadcast %cst_138 : f32 to vector<1x128xf32>
    %268 = arith.mulf %266, %267 : vector<1x128xf32>
    %269 = arith.mulf %262, %268 : vector<1x128xf32>
    %c7_i32 = arith.constant 7 : i32
    %270 = tpu.dynamic_rotate %230 by %c7_i32 dim 0 : vector<8x128xf32>, i32 -> vector<8x128xf32>
    %c1_i32_139 = arith.constant 1 : i32
    %271 = tpu.dynamic_rotate %230 by %c1_i32_139 dim 0 : vector<8x128xf32>, i32 -> vector<8x128xf32>
    %c7_i32_140 = arith.constant 7 : i32
    %272 = vector.broadcast %c7_i32_140 : i32 to vector<8x128xi32>
    %273 = arith.cmpi eq, %1, %272 : vector<8x128xi32>
    %274 = vector.shape_cast %269 : vector<1x128xf32> to vector<1x128xf32>
    %275 = vector.broadcast %274 : vector<1x128xf32> to vector<8x128xf32>
    %276 = arith.select %273, %275, %270 : vector<8x128xi1>, vector<8x128xf32>
    %c0_i32_141 = arith.constant 0 : i32
    %277 = vector.broadcast %c0_i32_141 : i32 to vector<8x128xi32>
    %278 = arith.cmpi eq, %1, %277 : vector<8x128xi32>
    %279 = vector.shape_cast %258 : vector<1x128xf32> to vector<1x128xf32>
    %280 = vector.broadcast %279 : vector<1x128xf32> to vector<8x128xf32>
    %281 = arith.select %278, %280, %271 : vector<8x128xi1>, vector<8x128xf32>
    %282 = vector.broadcast %0 : i32 to vector<8x128xi32>
    %283 = arith.addi %1, %282 : vector<8x128xi32>
    %c0_i32_142 = arith.constant 0 : i32
    %284 = vector.broadcast %c0_i32_142 : i32 to vector<8x128xi32>
    %285 = arith.cmpi eq, %283, %284 : vector<8x128xi32>
    %286 = arith.subf %276, %230 : vector<8x128xf32>
    %cst_143 = arith.constant 2.500000e+00 : f32
    %287 = vector.broadcast %cst_143 : f32 to vector<8x128xf32>
    %288 = arith.mulf %286, %287 : vector<8x128xf32>
    %c31_i32 = arith.constant 31 : i32
    %289 = vector.broadcast %c31_i32 : i32 to vector<8x128xi32>
    %290 = arith.cmpi eq, %283, %289 : vector<8x128xi32>
    %291 = arith.subf %230, %281 : vector<8x128xf32>
    %cst_144 = arith.constant 2.500000e+00 : f32
    %292 = vector.broadcast %cst_144 : f32 to vector<8x128xf32>
    %293 = arith.mulf %291, %292 : vector<8x128xf32>
    %294 = arith.subf %276, %281 : vector<8x128xf32>
    %cst_145 = arith.constant 1.250000e+00 : f32
    %295 = vector.broadcast %cst_145 : f32 to vector<8x128xf32>
    %296 = arith.mulf %294, %295 : vector<8x128xf32>
    %297 = arith.select %290, %293, %296 : vector<8x128xi1>, vector<8x128xf32>
    %298 = arith.select %285, %288, %297 : vector<8x128xi1>, vector<8x128xf32>
    %299 = arith.addf %247, %298 : vector<8x128xf32>
    %300 = arith.subf %228, %299 : vector<8x128xf32>
    %301 = vector.shape_cast %299 : vector<8x128xf32> to vector<1x1x8x128xf32>
    %c0_146 = arith.constant 0 : index
    %c0_147 = arith.constant 0 : index
    %c0_148 = arith.constant 0 : index
    %c0_149 = arith.constant 0 : index
    %302 = vector.load %arg9[%c0_146, %c0_147, %c0_148, %c0_149] : memref<1x1x8x128xf32, #tpu.memory_space<vmem>>, vector<1x1x8x128xf32>
    tpu.vector_store %arg9[%c0_146, %c0_147, %c0_148, %c0_149], %301 {strides = array<i32>} : memref<1x1x8x128xf32, #tpu.memory_space<vmem>>, vector<1x1x8x128xf32>,
    %303 = arith.mulf %300, %300 : vector<8x128xf32>
    %304 = vector.shape_cast %303 : vector<8x128xf32> to vector<1x8x128xf32>
    %cst_150 = arith.constant dense<0.000000e+00> : vector<1xf32>
    %305 = vector.multi_reduction <add>, %304, %cst_150 [1, 2] : vector<1x8x128xf32> to vector<1xf32>
    %306 = vector.shape_cast %305 : vector<1xf32> to vector<1x1x1xf32>
    %307 = vector.extract %306[0, 0, 0] : f32 from vector<1x1x1xf32>
    %308 = math.absf %300 : vector<8x128xf32>
    %309 = vector.shape_cast %308 : vector<8x128xf32> to vector<1x8x128xf32>
    %cst_151 = arith.constant dense<0xFF800000> : vector<1xf32>
    %310 = vector.multi_reduction <maximumf>, %309, %cst_151 [1, 2] : vector<1x8x128xf32> to vector<1xf32>
    %311 = vector.shape_cast %310 : vector<1xf32> to vector<1x1x1xf32>
    %312 = vector.extract %311[0, 0, 0] : f32 from vector<1x1x1xf32>
    %c0_152 = arith.constant 0 : index
    %c0_153 = arith.constant 0 : index
    %c0_154 = arith.constant 0 : index
    %c0_155 = arith.constant 0 : index
    %313 = vector.load %arg7[%c0_152, %c0_153, %c0_154, %c0_155] : memref<1x5x8x64xf32, #tpu.memory_space<vmem>>, vector<1x5x8x64xf32>
    %c0_156 = arith.constant 0 : index
    %c0_157 = arith.constant 0 : index
    %c0_158 = arith.constant 0 : index
    %c0_159 = arith.constant 0 : index
    %314 = vector.load %arg8[%c0_156, %c0_157, %c0_158, %c0_159] : memref<1x5x8x64xf32, #tpu.memory_space<vmem>>, vector<1x5x8x64xf32>
    %315 = arith.subf %313, %314 : vector<1x5x8x64xf32>
    %c0_i32_160 = arith.constant 0 : i32
    %316 = arith.cmpi eq, %arg1, %c0_i32_160 : i32
    %317 = arith.mulf %315, %315 : vector<1x5x8x64xf32>
    %318 = vector.shape_cast %317 : vector<1x5x8x64xf32> to vector<1x1x5x8x64xf32>
    %cst_161 = arith.constant dense<0.000000e+00> : vector<1xf32>
    %319 = vector.multi_reduction <add>, %318, %cst_161 [1, 2, 3, 4] : vector<1x1x5x8x64xf32> to vector<1xf32>
    %320 = vector.shape_cast %319 : vector<1xf32> to vector<1x1x1x1x1xf32>
    %321 = vector.extract %320[0, 0, 0, 0, 0] : f32 from vector<1x1x1x1x1xf32>
    %cst_162 = arith.constant 0.000000e+00 : f32
    %322 = arith.select %316, %321, %cst_162 : f32
    %323 = tpu.iota {dimensions = array<i32: 0>} : vector<8x128xi32>
    %c0_i32_163 = arith.constant 0 : i32
    %324 = vector.broadcast %c0_i32_163 : i32 to vector<8x128xi32>
    %325 = arith.cmpi eq, %323, %324 : vector<8x128xi32>
    %cst_164 = arith.constant 0.000000e+00 : f32
    %326 = vector.broadcast %177 : f32 to vector<8x128xf32>
    %327 = vector.broadcast %cst_164 : f32 to vector<8x128xf32>
    %328 = arith.select %325, %326, %327 : vector<8x128xi1>, vector<8x128xf32>
    %c1_i32_165 = arith.constant 1 : i32
    %329 = vector.broadcast %c1_i32_165 : i32 to vector<8x128xi32>
    %330 = arith.cmpi eq, %323, %329 : vector<8x128xi32>
    %cst_166 = arith.constant 0.000000e+00 : f32
    %331 = vector.broadcast %208 : f32 to vector<8x128xf32>
    %332 = vector.broadcast %cst_166 : f32 to vector<8x128xf32>
    %333 = arith.select %330, %331, %332 : vector<8x128xi1>, vector<8x128xf32>
    %334 = arith.addf %328, %333 : vector<8x128xf32>
    %c2_i32 = arith.constant 2 : i32
    %335 = vector.broadcast %c2_i32 : i32 to vector<8x128xi32>
    %336 = arith.cmpi eq, %323, %335 : vector<8x128xi32>
    %cst_167 = arith.constant 0.000000e+00 : f32
    %337 = vector.broadcast %186 : f32 to vector<8x128xf32>
    %338 = vector.broadcast %cst_167 : f32 to vector<8x128xf32>
    %339 = arith.select %336, %337, %338 : vector<8x128xi1>, vector<8x128xf32>
    %340 = arith.addf %334, %339 : vector<8x128xf32>
    %c3_i32 = arith.constant 3 : i32
    %341 = vector.broadcast %c3_i32 : i32 to vector<8x128xi32>
    %342 = arith.cmpi eq, %323, %341 : vector<8x128xi32>
    %cst_168 = arith.constant 0.000000e+00 : f32
    %343 = vector.broadcast %307 : f32 to vector<8x128xf32>
    %344 = vector.broadcast %cst_168 : f32 to vector<8x128xf32>
    %345 = arith.select %342, %343, %344 : vector<8x128xi1>, vector<8x128xf32>
    %346 = arith.addf %340, %345 : vector<8x128xf32>
    %c4_i32 = arith.constant 4 : i32
    %347 = vector.broadcast %c4_i32 : i32 to vector<8x128xi32>
    %348 = arith.cmpi eq, %323, %347 : vector<8x128xi32>
    %cst_169 = arith.constant 0.000000e+00 : f32
    %349 = vector.broadcast %312 : f32 to vector<8x128xf32>
    %350 = vector.broadcast %cst_169 : f32 to vector<8x128xf32>
    %351 = arith.select %348, %349, %350 : vector<8x128xi1>, vector<8x128xf32>
    %352 = arith.addf %346, %351 : vector<8x128xf32>
    %c5_i32 = arith.constant 5 : i32
    %353 = vector.broadcast %c5_i32 : i32 to vector<8x128xi32>
    %354 = arith.cmpi eq, %323, %353 : vector<8x128xi32>
    %cst_170 = arith.constant 0.000000e+00 : f32
    %355 = vector.broadcast %322 : f32 to vector<8x128xf32>
    %356 = vector.broadcast %cst_170 : f32 to vector<8x128xf32>
    %357 = arith.select %354, %355, %356 : vector<8x128xi1>, vector<8x128xf32>
    %358 = arith.addf %352, %357 : vector<8x128xf32>
    %359 = vector.shape_cast %358 : vector<8x128xf32> to vector<1x1x8x128xf32>
    %c0_171 = arith.constant 0 : index
    %c0_172 = arith.constant 0 : index
    %c0_173 = arith.constant 0 : index
    %c0_174 = arith.constant 0 : index
    %360 = vector.load %arg10[%c0_171, %c0_172, %c0_173, %c0_174] : memref<1x1x8x128xf32, #tpu.memory_space<vmem>>, vector<1x1x8x128xf32>
    tpu.vector_store %arg10[%c0_171, %c0_172, %c0_173, %c0_174], %359 {strides = array<i32>} : memref<1x1x8x128xf32, #tpu.memory_space<vmem>>, vector<1x1x8x128xf32>,
    return
  }
  func.func @transform_0(%arg0: i32, %arg1: i32) -> (i32, i32, i32, i32) {
    %c0_i32 = arith.constant 0 : i32
    %c0_i32_0 = arith.constant 0 : i32
    %c0_i32_1 = arith.constant 0 : i32
    return %arg0, %c0_i32, %arg1, %c0_i32_0 : i32, i32, i32, i32
  }
  func.func @transform_1(%arg0: i32, %arg1: i32) -> (i32, i32, i32, i32) {
    %c0_i32 = arith.constant 0 : i32
    %c0_i32_0 = arith.constant 0 : i32
    %c0_i32_1 = arith.constant 0 : i32
    return %arg0, %c0_i32, %arg1, %c0_i32_0 : i32, i32, i32, i32
  }
  func.func @transform_2(%arg0: i32, %arg1: i32) -> (i32, i32, i32, i32) {
    %c0_i32 = arith.constant 0 : i32
    %c0_i32_0 = arith.constant 0 : i32
    %c0_i32_1 = arith.constant 0 : i32
    return %arg0, %c0_i32, %arg1, %c0_i32_0 : i32, i32, i32, i32
  }
  func.func @transform_3(%arg0: i32, %arg1: i32) -> (i32, i32, i32, i32) {
    %c1_i32 = arith.constant 1 : i32
    %0 = arith.muli %arg1, %c1_i32 : i32
    %c1_i32_0 = arith.constant 1 : i32
    %1 = arith.subi %0, %c1_i32_0 : i32
    %c0_i32 = arith.constant 0 : i32
    %2 = arith.maxsi %1, %c0_i32 : i32
    %c0_i32_1 = arith.constant 0 : i32
    %c0_i32_2 = arith.constant 0 : i32
    %c0_i32_3 = arith.constant 0 : i32
    return %arg0, %c0_i32_1, %2, %c0_i32_2 : i32, i32, i32, i32
  }
  func.func @transform_4(%arg0: i32, %arg1: i32) -> (i32, i32, i32, i32) {
    %c1_i32 = arith.constant 1 : i32
    %0 = arith.addi %arg1, %c1_i32 : i32
    %c1_i32_0 = arith.constant 1 : i32
    %1 = arith.muli %0, %c1_i32_0 : i32
    %c3_i32 = arith.constant 3 : i32
    %2 = arith.minsi %1, %c3_i32 : i32
    %c0_i32 = arith.constant 0 : i32
    %c0_i32_1 = arith.constant 0 : i32
    %c0_i32_2 = arith.constant 0 : i32
    return %arg0, %c0_i32, %2, %c0_i32_1 : i32, i32, i32, i32
  }
  func.func @transform_5(%arg0: i32, %arg1: i32) -> (i32, i32, i32, i32) {
    %c0_i32 = arith.constant 0 : i32
    %c0_i32_0 = arith.constant 0 : i32
    %c0_i32_1 = arith.constant 0 : i32
    %c0_i32_2 = arith.constant 0 : i32
    return %arg0, %c0_i32, %c0_i32_0, %c0_i32_1 : i32, i32, i32, i32
  }
  func.func @transform_6(%arg0: i32, %arg1: i32) -> (i32, i32, i32, i32) {
    %c0_i32 = arith.constant 0 : i32
    %c0_i32_0 = arith.constant 0 : i32
    %c0_i32_1 = arith.constant 0 : i32
    %c0_i32_2 = arith.constant 0 : i32
    return %arg0, %c0_i32, %c0_i32_0, %c0_i32_1 : i32, i32, i32, i32
  }
  func.func @transform_7(%arg0: i32, %arg1: i32) -> (i32, i32, i32, i32) {
    %c0_i32 = arith.constant 0 : i32
    %c0_i32_0 = arith.constant 0 : i32
    %c0_i32_1 = arith.constant 0 : i32
    return %arg0, %c0_i32, %arg1, %c0_i32_0 : i32, i32, i32, i32
  }
  func.func @transform_8(%arg0: i32, %arg1: i32) -> (i32, i32, i32, i32) {
    %c0_i32 = arith.constant 0 : i32
    %c0_i32_0 = arith.constant 0 : i32
    %c0_i32_1 = arith.constant 0 : i32
    return %arg0, %arg1, %c0_i32, %c0_i32_0 : i32, i32, i32, i32
  }
}

</mosaic_0001>

<bundles_post_ra>
// kernel: tpu_custom_call.1
= control target key start
LH: loop header
LB: loop body
LE: loop exit
PB: predicated region body
PF: predicated region fallthrough
CT: control target
= control target key end

     0   :  { %s3005_s0 = inlined_call_operand.hbm [shape: f32[2,5,32,128], index: 0, kind: input, shape index: {}]   ;;  %s3006_s1 = inlined_call_operand.hbm [shape: f32[2,5,32,128], index: 1, kind: input, shape index: {}]   ;;  %s3007_s2 = inlined_call_operand.hbm [shape: f32[2,5,32,128], index: 2, kind: input, shape index: {}]   ;;  %s3008_s3 = inlined_call_operand.hbm [shape: f32[2,5,32,128], index: 3, kind: input, shape index: {}]   ;;  %s3009_s4 = inlined_call_operand.hbm [shape: f32[2,5,32,128], index: 4, kind: input, shape index: {}]   ;;  %s3010_s5 = inlined_call_operand.hbm [shape: f32[2,5,8,64], index: 5, kind: input, shape index: {}]   ;;  %s3011_s6 = inlined_call_operand.hbm [shape: f32[2,5,8,64], index: 6, kind: input, shape index: {}]   ;;  %s3012_s7 = inlined_call_operand.hbm [shape: f32[2,1,32,128], index: 7, kind: output, shape index: {0}]   ;;  %s3013_s8 = inlined_call_operand.hbm [shape: f32[2,4,8,128], index: 8, kind: output, shape index: {1}]  }
   0x1   :  { %3081 = sst [smem:[#allocation54_spill]] %s3005_s0 }
   0x2   :  { %3082 = sst [smem:[#allocation55_spill]] %s3006_s1 }
   0x3   :  { %3083 = sst [smem:[#allocation56_spill]] %s3007_s2 }
   0x4   :  { %3084 = sst [smem:[#allocation57_spill]] %s3008_s3 }
   0x5   :  { %3085 = sst [smem:[#allocation58_spill]] %s3009_s4 }
   0x6   :  { %3086 = sst [smem:[#allocation59_spill]] %s3010_s5 }
   0x7   :  { %3087 = sst [smem:[#allocation60_spill]] %s3011_s6 }
   0x8   :  { %3088 = sst [smem:[#allocation61_spill]] %s3012_s7 }
   0x9   :  { %3089 = sst [smem:[#allocation62_spill]] %s3013_s8 }
   0xa   :  { %14 = vsyncpa [#allocation3], 0 }
   0xb   :  { %16 = vsyncpa [#allocation3 + $0x1], 0 }
   0xc   :  { %17 = vsyncpa [#allocation6], 0 }
   0xd   :  { %19 = vsyncpa [#allocation6 + $0x1], 0 }
   0xe   :  { %20 = vsyncpa [#allocation9], 0 }
   0xf   :  { %22 = vsyncpa [#allocation9 + $0x1], 0 }
  0x10   :  { %23 = vsyncpa [#allocation12], 0 }
  0x11   :  { %25 = vsyncpa [#allocation12 + $0x1], 0 }
  0x12   :  { %26 = vsyncpa [#allocation4], 0 }
  0x13   :  { %28 = vsyncpa [#allocation4 + $0x1], 0 }
  0x14   :  { %29 = vsyncpa [#allocation16], 0 }
  0x15   :  { %31 = vsyncpa [#allocation16 + $0x1], 0  ;;  %s2157_s27 = smov 0   ;;  %s2159_s28 = smov 0  }
  0x16   :  { %s2161_s29 = smov 0   ;;  %s2163_s30 = smov 0  }
  0x17   :  { %s2165_s9 = smov 0   ;;  %s2167_s10 = smov 0  }
  0x18   :  { %s2169_s11 = smov 0   ;;  %s2171_s12 = smov 0  }
  0x19   :  { %s2173_s13 = smov 0   ;;  %s2175_s14 = smov 0  }
  0x1a   :  { %s2177_s15 = smov 0   ;;  %s2179_s16 = smov 0  }
  0x1b   :  { %s2181_s17 = smov 0   ;;  %s2183_s18 = smov 0  }
  0x1c   :  { %s2185_s19 = smov 0   ;;  %s2187_s20 = smov 0  }
  0x1d   :  { %s2189_s21 = smov 0  }
  0x1e LB: > { %3090 = sst [smem:[#allocation24_spill]] %s2035_s28  ;;  %s2243_s22 = sadd.s32 4294967295, %s2095_s21   ;;  %s2095_s21 = sphi %s2189_s21, %s37_s21   ;;  %s2091_s20 = sphi %s2187_s20, %s3218_s20   ;;  %s2087_s19 = sphi %s2185_s19, %s3217_s19   ;;  %s2083_s18 = sphi %s2183_s18, %s3216_s18   ;;  %s2079_s17 = sphi %s2181_s17, %s3215_s17   ;;  %s2075_s16 = sphi %s2179_s16, %s3214_s16   ;;  %s2071_s15 = sphi %s2177_s15, %s3213_s15   ;;  %s2067_s14 = sphi %s2175_s14, %s3212_s14   ;;  %s2063_s13 = sphi %s2173_s13, %s3211_s13   ;;  %s2059_s12 = sphi %s2171_s12, %s3210_s12   ;;  %s2055_s11 = sphi %s2169_s11, %s3209_s11   ;;  %s2051_s10 = sphi %s2167_s10, %s3208_s10   ;;  %s2047_s9 = sphi %s2165_s9, %s3207_s9   ;;  %s2043_s30 = sphi %s2163_s30, %s3206_s30   ;;  %s2039_s29 = sphi %s2161_s29, %s3205_s29   ;;  %s2035_s28 = sphi %s2159_s28, %s3204_s28   ;;  %s2031_s27 = sphi %s2157_s27, %s3203_s27  }
  0x1f   : > { %3091 = sst [smem:[#allocation25_spill]] %s2039_s29  ;;  %s1371_s23 = sadd.s32 4294967294, %s2095_s21  }
  0x20   : > { %3092 = sst [smem:[#allocation26_spill]] %s2043_s30  ;;  %s2247_s24 = sadd.s32 1, %s2087_s19 }
  0x21   : > { %3093 = sst [smem:[#allocation27_spill]] %s2047_s9  ;;  %p3034_p0 = scmp.ge.s32.totalorder %s2247_s24, 4 }
  0x22   : > { %3094 = sst [smem:[#allocation28_spill]] %s2051_s10  ;;  %p65_p1 = scmp.ne.s32.totalorder %s2075_s16, %s2071_s15 }
  0x23   : > { %3095 = sst [smem:[#allocation29_spill]] %s2059_s12  ;;  %p3033_p2 = scmp.eq.s32.totalorder %s2095_s21, 0 }
  0x24   : > { %3096 = sst [smem:[#allocation30_spill]] %s2063_s13  ;;  %p71_p3 = scmp.ne.s32.totalorder %s2071_s15, %s2067_s14 }
  0x25   : > { %3097 = sst [smem:[#allocation31_spill]] %s2067_s14  ;;  %p67_p4 = por %p3033_p2, %p65_p1 }
  0x26   : > { %3098 = sst [smem:[#allocation32_spill]] %s2071_s15  ;;  %p3032_p5 = scmp.eq.s32.totalorder %s2243_s22, 0 }
  0x27   : > { %3099 = sst [smem:[#allocation33_spill]] %s2075_s16  ;;  %p273_p6 = scmp.eq.s32.totalorder %s2243_s22, 7 }
  0x28   : > { %3100 = sst [smem:[#allocation34_spill]] %s2079_s17  ;;  %p2269_p7 = por %p3032_p5, %p71_p3 }
  0x29   : > { %3101 = sst [smem:[#allocation35_spill]] %s2083_s18  ;;  %p279_p8 = scmp.eq.s32.totalorder %s1371_s23, 7 }
  0x2a   : > { %3102 = sst [smem:[#allocation36_spill]] %s2087_s19  ;;  %p2273_p9 = por %p273_p6, %p65_p1 }
  0x2b   : > { %3103 = sst [smem:[#allocation37_spill]] %s2091_s20  ;;  %p2277_p10 = por %p279_p8, %p71_p3 }
  0x2c   : > { %3104 = sst [smem:[#allocation38_spill]] %s2095_s21  ;;  %p3031_p11 = scmp.lt.s32.totalorder %s2095_s21, 8 }
  0x2d   : > { %3105 = sst [smem:[#allocation39_spill]] %s2247_s24  ;;  %s2283_s18 = sand.u32 1, %s2075_s16  }
  0x2e   : > { %s2259_s26 = scalar_select %p3034_p0, 0, %s2247_s24  }
  0x2f   : > { %s3107_s25 = scalar_select %p2269_p7, 1, 0 }
  0x30   : > { %3106 = sst [smem:[#allocation40_spill]] %s2259_s26  ;;  %s2286_s8 = smul.u32 20, %s2091_s20 }
  0x31   : > { %3108 = sst [smem:[#allocation41_spill]] %s3107_s25  ;;  %s3029_s17 = smul.u32 40, %s2283_s18 }
  0x32   : > { %s3109_s14 = scalar_select %p2273_p9, 1, 0 }
  0x33   : > { %s3111_s7 = scalar_select %p2277_p10, 1, 0 }
  0x34   : > { %3110 = sst [smem:[#allocation42_spill]] %s3109_s14  ;;  %p2291_p12 = pnand %p3031_p11, %p67_p4 }
  0x35   : > { %3112 = sst [smem:[#allocation43_spill]] %s3111_s7  ;;  %s336_s14 = sadd.s32 %s2087_s19, %s2286_s8 }
  0x36   : > { %3113 = sst [smem:[#allocation44_spill]] %s2283_s18  ;;  %s2297_s25 = sshll.u32 %s336_s14, 7 }
  0x37   : > { %s3114_s23 = scalar_select %p2291_p12, 1, 0 }
  0x38   : > { %s2300_s7 = sand.u32 1, %s2095_s21   ;;  %s3116_s1 = sld [smem:[#allocation55_spill]] }
  0x39   : > { %3115 = sst [smem:[#allocation45_spill]] %s3114_s23  ;;  %s353_s30 = scalar_lea.vmem [#allocation5], %s3029_s17 }
  0x3a   : > { %s361_s9 = sshll.u32 %s353_s30, 4  ;;  %p2319_p4 = pneg %p2291_p12  ;;  %s2311_s9 = int_to_ptr.vmem [resolvable:$true] %s361_s9 }
  0x3c   : > { %s3117_s6 = scalar_select %p2319_p4, 1, 0 }
  0x3e   : > { %s2306_s4 = scalar_lea.hbm %s3116_s1, %s2297_s25  ;;  %3118 = sst [smem:[#allocation46_spill]] %s3117_s6 }
  0x3f   : > { %s1667_s10 = scalar_lea.hbm %s2306_s4, 640  ;;  %s1672_s30 = scalar_lea.hbm %s3116_s1, 5120 }
  0x40   : > { %p1668_p3 = scmp.ne.s32.totalorder %s2306_s4, %s1667_s10  ;;  %p1673_p11 = scmp.lt.u32.totalorder %s2306_s4, %s3116_s1 }
  0x41   : > { %p1674_p5 = scmp.lt.u32.totalorder %s1672_s30, %s1667_s10  ;;  %p1676_p0 = scmp.lt.u32.totalorder %s1667_s10, %s2306_s4 }
  0x42   : > { %p1670_p6 = pnand %p2319_p4, %p1668_p3 }
  0x43   : > { %p1675_p2 = por %p1674_p5, %p1673_p11 }
  0x44   : > { %p1671_p8 = pneg %p1670_p6 }
  0x45   : > { %p1677_p13 = por %p1676_p0, %p1675_p2 }
  0x47   : > { %p1678_p1 = pnand %p1677_p13, %p1671_p8 }
  0x49   : > { %1681 = shalt.err (!%p1678_p1)
}
  0x4a   : > { %s1682_s14 = scalar_lea.vmem %s2311_s9, 640  ;;  %s2097_s2 = smov [#allocation5]  }
  0x4b   : > { %p1683_p3 = scmp.ne.s32.totalorder %s2311_s9, %s1682_s14  ;;  %s1687_s15 = sshll.u32 %s2097_s2, 4  ;;  %s1688_s15 = int_to_ptr.vmem [resolvable:$false] %s1687_s15 }
  0x4c   : > { %s1689_s0 = scalar_lea.vmem %s1688_s15, 1280  ;;  %p1690_p9 = scmp.lt.s32.totalorder %s2311_s9, %s1688_s15 }
  0x4d   : > { %p1685_p6 = pnand %p1683_p3, %p2319_p4  ;;  %p1691_p7 = scmp.lt.s32.totalorder %s1689_s0, %s1682_s14 }
  0x4f   : > { %p1686_p10 = pneg %p1685_p6  ;;  %p1692_p5 = por %p1691_p7, %p1690_p9 }
  0x51   : > { %p1693_p11 = pnand %p1692_p5, %p1686_p10 }
  0x53   : > { %1696 = shalt.err (!%p1693_p11)
}
  0x54   : > { %s3037_s10 = smov 512   ;;  %s3039_s17 = smov 128  }
  0x55   : > { %s3041_s14 = smov 8   ;;  %s3119_s30 = scalar_lea.sflag [#allocation6], %s2300_s7 }
  0x56   : > { %1500 = dma.hbm_to_vmem [thread:$0]  (!%p2291_p12), %s2306_s4, 640, %s2311_s9, %s3119_s30, %s3037_s10, %s3039_s17, %s3041_s14  }
  0x57   : > { %p3120_p0 = scmp.lt.s32.totalorder %s2095_s21, 9  ;;  %p3121_p2 = scmp.ge.s32.totalorder %s2095_s21, 1 }
  0x58   : > { %s49_s15 = sadd.s32 1, %s2091_s20  ;;  %p3124_p9 = scmp.ge.s32.totalorder %s2247_s24, 4 }
  0x59   : > { %p2351_p7 = pnand %p3121_p2, %p3120_p0  ;;  %s1372_s0 = sadd.s32 4294967295, %s2087_s19 }
  0x5a   : > { %s3220_s15 = smov (!%p3124_p9, %s49_s15), %s2091_s20  ;;  %s1373_s1 = sadd.s32 4294967295, %s2259_s26 }
  0x5b   : > { %s3122_s2 = scalar_select %p2351_p7, 1, 0 }
  0x5c   : > { %p51_p10 = scmp.ge.s32.totalorder %s3220_s15, 2  ;;  %p138_p13 = scmp.gt.s32.totalorder %s1372_s0, 0 }
  0x5d   : > { %3123 = sst [smem:[#allocation47_spill]] %s3122_s2  ;;  %p141_p1 = scmp.gt.s32.totalorder %s1373_s1, 0 }
  0x5e   : > { %s148_s4 = sadd.s32 1, %s2063_s13  ;;  %s3222_s15 = smov (%p51_p10, %s3220_s15), 0 }
  0x5f   : > { %3125 = sst [smem:[#allocation48_spill]] %s3222_s15  ;;  %s3224_s0 = smov (!%p138_p13, %s1372_s0), 0 }
  0x60   : > { %s2366_s9 = ssub.s32 %s2091_s20, %s3222_s15  ;;  %p155_p8 = scmp.ne.s32.totalorder %s2063_s13, %s2059_s12 }
  0x61   : > { %s3126_s30 = ssub.s32 %s2087_s19, %s2259_s26  ;;  %p161_p3 = scmp.ne.s32.totalorder %s2059_s12, %s2055_s11 }
  0x62   : > { %s55_s10 = sor.u32 %s3126_s30, %s2366_s9  ;;  %p3127_p5 = scmp.eq.s32.totalorder %s2095_s21, 0 }
  0x63   : > { %p56_p6 = scmp.eq.s32.totalorder %s55_s10, 0  ;;  %s3226_s1 = smov (!%p141_p1, %s1373_s1), 0 }
  0x64   : > { %p2378_p11 = por %p155_p8, %p3127_p5  ;;  %s3129_s14 = sadd.s32 1, %s2075_s16 }
  0x65   : > { %s2385_s2 = scalar_select %p56_p6, %s2075_s16, %s3129_s14  }
  0x66   : > { %s144_s15 = ssub.s32 %s3224_s0, %s3226_s1  ;;  %p3131_p0 = scmp.eq.s32.totalorder %s2243_s22, 0 }
  0x67   : > { %3130 = sst [smem:[#allocation49_spill]] %s2385_s2  ;;  %s145_s11 = sor.u32 %s144_s15, %s2366_s9 }
  0x68   : > { %p2389_p2 = por %p161_p3, %p3131_p0  ;;  %p146_p9 = scmp.eq.s32.totalorder %s145_s11, 0 }
  0x69   : > { %s393_s10 = sand.u32 1, %s2063_s13   ;;  %s403_s19 = sadd.s32 %s2286_s8, %s3224_s0 }
  0x6a   : > { %s3132_s24 = scalar_select %p2389_p2, 1, 0 }
  0x6b   : > { %s1418_s30 = smul.u32 40, %s393_s10  ;;  %s1381_s26 = sshll.u32 %s403_s19, 7 }
  0x6c   : > { %s2397_s12 = scalar_select %p146_p9, %s2063_s13, %s148_s4  }
  0x6d   : > { %s3134_s3 = sld [smem:[#allocation57_spill]]  ;;  %s395_s1 = scalar_lea.vmem [#allocation8], %s1418_s30 }
  0x6e   : > { %3133 = sst [smem:[#allocation50_spill]] %s2397_s12  ;;  %s406_s14 = sshll.u32 %s395_s1, 4  ;;  %s2404_s14 = int_to_ptr.vmem [resolvable:$true] %s406_s14 }
  0x6f   : > { %p3135_p10 = scmp.lt.s32.totalorder %s2095_s21, 8  ;;  %s3059_s19 = scalar_lea.sflag [#allocation9], %s2300_s7 }
  0x71   : > { %p2410_p13 = pnand %p3135_p10, %p2378_p11 }
  0x73   : > { %s2402_s18 = scalar_lea.hbm %s3134_s3, %s1381_s26  ;;  %p1699_p8 = pneg %p2410_p13 }
  0x74   : > { %s1697_s23 = scalar_lea.hbm %s2402_s18, 640  ;;  %s1702_s17 = scalar_lea.hbm %s3134_s3, 5120 }
  0x75   : > { %p1698_p1 = scmp.ne.s32.totalorder %s2402_s18, %s1697_s23  ;;  %p1703_p5 = scmp.lt.u32.totalorder %s2402_s18, %s3134_s3 }
  0x76   : > { %p1704_p11 = scmp.lt.u32.totalorder %s1702_s17, %s1697_s23  ;;  %p1706_p9 = scmp.lt.u32.totalorder %s1697_s23, %s2402_s18 }
  0x77   : > { %p1700_p3 = pnand %p1699_p8, %p1698_p1 }
  0x78   : > { %p1705_p0 = por %p1704_p11, %p1703_p5 }
  0x79   : > { %p1701_p6 = pneg %p1700_p3 }
  0x7a   : > { %p1707_p10 = por %p1706_p9, %p1705_p0 }
  0x7c   : > { %p1708_p2 = pnand %p1707_p10, %p1701_p6 }
  0x7e   : > { %1711 = shalt.err (!%p1708_p2)
}
  0x7f   : > { %s1712_s11 = scalar_lea.vmem %s2404_s14, 640  ;;  %s2101_s10 = smov [#allocation8]  }
  0x80   : > { %p1713_p1 = scmp.ne.s32.totalorder %s2404_s14, %s1712_s11  ;;  %s1717_s30 = sshll.u32 %s2101_s10, 4  ;;  %s1718_s30 = int_to_ptr.vmem [resolvable:$false] %s1717_s30 }
  0x81   : > { %s1719_s1 = scalar_lea.vmem %s1718_s30, 1280  ;;  %p1720_p12 = scmp.lt.s32.totalorder %s2404_s14, %s1718_s30 }
  0x82   : > { %p1715_p3 = pnand %p1713_p1, %p1699_p8  ;;  %p1721_p5 = scmp.lt.s32.totalorder %s1719_s1, %s1712_s11 }
  0x84   : > { %p1716_p7 = pneg %p1715_p3  ;;  %p1722_p11 = por %p1721_p5, %p1720_p12 }
  0x86   : > { %p1723_p0 = pnand %p1722_p11, %p1716_p7 }
  0x88   : > { %1726 = shalt.err (!%p1723_p0)
}
  0x89   : > { %s3137_s23 = smov 8   ;;  %s3138_s26 = smov 128  }
  0x8a   : > { %s3139_s6 = smov 512   ;;  %p206_p12 = scmp.eq.s32.totalorder %s2366_s9, 0 }
  0x8b   : > { %1506 = dma.hbm_to_vmem [thread:$0]  (!%p2410_p13), %s2402_s18, 640, %s2404_s14, %s3059_s19, %s3139_s6, %s3138_s26, %s3137_s23  }
  0x8c   : > { %s208_s15 = sadd.s32 1, %s2039_s29  ;;  %p215_p7 = scmp.ne.s32.totalorder %s2039_s29, %s2035_s28 }
  0x8d   : > { %s2450_s17 = scalar_select %p206_p12, %s2039_s29, %s208_s15  }
  0x8e   : > { %p3141_p2 = scmp.eq.s32.totalorder %s2095_s21, 0  ;;  %p221_p6 = scmp.ne.s32.totalorder %s2035_s28, %s2031_s27 }
  0x8f   : > { %3140 = sst [smem:[#allocation51_spill]] %s2450_s17  ;;  %s443_s0 = sand.u32 1, %s2039_s29  }
  0x90   : > { %p217_p8 = por %p215_p7, %p3141_p2  ;;  %p3142_p9 = scmp.eq.s32.totalorder %s2243_s22, 0 }
  0x91   : > { %s2463_s11 = smul.u32 40, %s443_s0  ;;  %p3145_p13 = scmp.lt.s32.totalorder %s2095_s21, 8 }
  0x92   : > { %p2459_p10 = por %p221_p6, %p3142_p9  ;;  %s3060_s10 = smul.u32 640, %s2091_s20 }
  0x93   : > { %p2468_p1 = pnand %p3145_p13, %p217_p8  ;;  %s3147_s5 = sld [smem:[#allocation59_spill]] }
  0x94   : > { %s3143_s4 = scalar_select %p2459_p10, 1, 0 }
  0x95   : > { %s3146_s18 = scalar_select %p2468_p1, 1, 0 }
  0x96   : > { %3144 = sst [smem:[#allocation52_spill]] %s3143_s4  ;;  %s445_s1 = scalar_lea.vmem [#allocation11], %s2463_s11 }
  0x97   : > { %s452_s15 = sshll.u32 %s445_s1, 4  ;;  %s3066_s0 = scalar_lea.sflag [#allocation12], %s2300_s7  ;;  %s2480_s15 = int_to_ptr.vmem [resolvable:$true] %s452_s15 }
  0x98   : > { %p3065_p5 = pneg %p2468_p1 }
  0x99   : > { %s2477_s27 = scalar_lea.hbm %s3147_s5, %s3060_s10  ;;  %s1732_s10 = scalar_lea.hbm %s3147_s5, 1280 }
  0x9a   : > { %s1727_s19 = scalar_lea.hbm %s2477_s27, 640  ;;  %p1733_p12 = scmp.lt.u32.totalorder %s2477_s27, %s3147_s5 }
  0x9b   : > { %p1728_p3 = scmp.ne.s32.totalorder %s2477_s27, %s1727_s19  ;;  %p1734_p7 = scmp.lt.u32.totalorder %s1732_s10, %s1727_s19 }
  0x9c   : > { %p1736_p8 = scmp.lt.u32.totalorder %s1727_s19, %s2477_s27 }
  0x9d   : > { %p1730_p11 = pnand %p3065_p5, %p1728_p3  ;;  %p1735_p2 = por %p1734_p7, %p1733_p12 }
  0x9f   : > { %p1731_p0 = pneg %p1730_p11  ;;  %p1737_p6 = por %p1736_p8, %p1735_p2 }
  0xa1   : > { %p1738_p9 = pnand %p1737_p6, %p1731_p0 }
  0xa3   : > { %1741 = shalt.err (!%p1738_p9)
}
  0xa4   : > { %s1742_s1 = scalar_lea.vmem %s2480_s15, 640  ;;  %s2102_s14 = smov [#allocation11]  }
  0xa5   : > { %p1743_p13 = scmp.ne.s32.totalorder %s2480_s15, %s1742_s1  ;;  %s1747_s30 = sshll.u32 %s2102_s14, 4  ;;  %s1748_s30 = int_to_ptr.vmem [resolvable:$false] %s1747_s30 }
  0xa6   : > { %s1749_s3 = scalar_lea.vmem %s1748_s30, 1280  ;;  %p1750_p10 = scmp.lt.s32.totalorder %s2480_s15, %s1748_s30 }
  0xa7   : > { %p1745_p3 = pnand %p1743_p13, %p3065_p5  ;;  %p1751_p12 = scmp.lt.s32.totalorder %s1749_s3, %s1742_s1 }
  0xa9   : > { %p1746_p11 = pneg %p1745_p3  ;;  %p1752_p7 = por %p1751_p12, %p1750_p10 }
  0xab   : > { %p1753_p2 = pnand %p1752_p7, %p1746_p11 }
  0xad   : > { %1756 = shalt.err (!%p1753_p2)
}
  0xae   : > { %s3148_s2 = sld [smem:[#allocation44_spill]]  ;;  %s3150_s14 = sld [smem:[#allocation54_spill]] }
  0xaf   : > { %1512 = dma.hbm_to_vmem [thread:$0]  (!%p2468_p1), %s2477_s27, 640, %s2480_s15, %s3066_s0, %s3138_s26, %s3138_s26, %s3137_s23  }
  0xb4   : > { %s3151_s3 = smov %s3150_s14  ;;  %s2517_s30 = scalar_lea.hbm %s3150_s14, %s2297_s25 }
  0xb5   : > { %s3152_s5 = smul.u32 40, %s3148_s2  ;;  %s1378_s13 = sshll.u32 %s3148_s2, 3 }
  0xb6   : > { %s328_s17 = scalar_lea.sflag [#allocation3], %s3148_s2  ;;  %s1757_s29 = scalar_lea.hbm %s2517_s30, 640 }
  0xb7   : > { %s331_s16 = scalar_lea.vmem [#allocation2], %s3152_s5  ;;  %p1758_p10 = scmp.ne.s32.totalorder %s2517_s30, %s1757_s29 }
  0xb8   : > { %s339_s12 = sshll.u32 %s331_s16, 4  ;;  %s1762_s10 = scalar_lea.hbm %s3151_s3, 5120  ;;  %s2522_s12 = int_to_ptr.vmem [resolvable:$true] %s339_s12 }
  0xb9   : > { %p1760_p0 = pnand %p1758_p10, %p2319_p4  ;;  %p1763_p6 = scmp.lt.u32.totalorder %s2517_s30, %s3151_s3 }
  0xba   : > { %p1764_p9 = scmp.lt.u32.totalorder %s1762_s10, %s1757_s29  ;;  %p1766_p3 = scmp.lt.u32.totalorder %s1757_s29, %s2517_s30 }
  0xbb   : > { %p1761_p8 = pneg %p1760_p0 }
  0xbc   : > { %p1765_p13 = por %p1764_p9, %p1763_p6 }
  0xbe   : > { %p1767_p11 = por %p1766_p3, %p1765_p13 }
  0xc0   : > { %p1768_p12 = pnand %p1767_p11, %p1761_p8 }
  0xc2   : > { %1771 = shalt.err (!%p1768_p12)
}
  0xc3   : > { %s1772_s5 = scalar_lea.vmem %s2522_s12, 640  ;;  %s2103_s16 = smov [#allocation2]  }
  0xc4   : > { %p1773_p7 = scmp.ne.s32.totalorder %s2522_s12, %s1772_s5  ;;  %s1777_s27 = sshll.u32 %s2103_s16, 4  ;;  %s1778_s27 = int_to_ptr.vmem [resolvable:$false] %s1777_s27 }
  0xc5   : > { %s1779_s15 = scalar_lea.vmem %s1778_s27, 1280  ;;  %p1780_p0 = scmp.lt.s32.totalorder %s2522_s12, %s1778_s27 }
  0xc6   : > { %p1775_p2 = pnand %p1773_p7, %p2319_p4  ;;  %p1781_p5 = scmp.lt.s32.totalorder %s1779_s15, %s1772_s5 }
  0xc8   : > { %p1776_p10 = pneg %p1775_p2  ;;  %p1782_p6 = por %p1781_p5, %p1780_p0 }
  0xca   : > { %p1783_p9 = pnand %p1782_p6, %p1776_p10 }
  0xcc   : > { %1786 = shalt.err (!%p1783_p9)
}
  0xcd   : > { %s3153_s29 = sld [smem:[#allocation45_spill]]  ;;  %s3155_s14 = sld [smem:[#allocation56_spill]] }
  0xce   : > { %s375_s16 = scalar_lea.vmem [#allocation7], %s1378_s13 }
  0xcf   : > { %s384_s27 = sshll.u32 %s375_s16, 4  ;;  %s385_s27 = int_to_ptr.vmem [resolvable:$true] %s384_s27 }
  0xd3   : > { %p3154_p8 = scmp.ne.s32.totalorder %s3153_s29, 0  ;;  %s3156_s0 = smov %s3155_s14 }
  0xd4   : > { %s2555_s5 = scalar_lea.hbm %s3155_s14, %s2297_s25 }
  0xd5   : > { %1497 = dma.hbm_to_vmem [thread:$0]  (!%p3154_p8), %s2517_s30, 640, %s2522_s12, %s328_s17, %s3139_s6, %s3138_s26, %s3137_s23  }
  0xd6   : > { %s1787_s15 = scalar_lea.hbm %s2555_s5, 128  ;;  %s1792_s17 = scalar_lea.hbm %s3156_s0, 5120 }
  0xd7   : > { %p1788_p5 = scmp.ne.s32.totalorder %s2555_s5, %s1787_s15  ;;  %p1793_p11 = scmp.lt.u32.totalorder %s2555_s5, %s3156_s0 }
  0xd8   : > { %p1794_p12 = scmp.lt.u32.totalorder %s1792_s17, %s1787_s15  ;;  %p1796_p2 = scmp.lt.u32.totalorder %s1787_s15, %s2555_s5 }
  0xd9   : > { %p1790_p13 = pnand %p1788_p5, %p2319_p4 }
  0xda   : > { %p1795_p7 = por %p1794_p12, %p1793_p11 }
  0xdb   : > { %p1791_p3 = pneg %p1790_p13 }
  0xdc   : > { %p1797_p10 = por %p1796_p2, %p1795_p7 }
  0xde   : > { %p1798_p0 = pnand %p1797_p10, %p1791_p3 }
  0xe0   : > { %1801 = shalt.err (!%p1798_p0)
}
  0xe1   : > { %s1802_s13 = scalar_lea.vmem %s385_s27, 128  ;;  %s2104_s2 = smov [#allocation7]  }
  0xe2   : > { %p1803_p6 = scmp.ne.s32.totalorder %s385_s27, %s1802_s13  ;;  %s1807_s10 = sshll.u32 %s2104_s2, 4  ;;  %s1808_s10 = int_to_ptr.vmem [resolvable:$false] %s1807_s10 }
  0xe3   : > { %s1809_s3 = scalar_lea.vmem %s1808_s10, 256  ;;  %p1810_p13 = scmp.lt.s32.totalorder %s385_s27, %s1808_s10 }
  0xe4   : > { %p1805_p9 = pnand %p1803_p6, %p2319_p4  ;;  %p1811_p1 = scmp.lt.s32.totalorder %s1809_s3, %s1802_s13 }
  0xe6   : > { %p1806_p5 = pneg %p1805_p9  ;;  %p1812_p8 = por %p1811_p1, %p1810_p13 }
  0xe8   : > { %p1813_p11 = pnand %p1812_p8, %p1806_p5 }
  0xea   : > { %1816 = shalt.err (!%p1813_p11)
}
  0xeb   : > { %p3157_p12 = scmp.ne.s32.totalorder %s3153_s29, 0  ;;  %s3158_s1 = scalar_lea.sflag [#allocation6], %s2300_s7 }
  0xec   : > { %s3159_s14 = sld [smem:[#allocation39_spill]]  ;;  %s3160_s16 = sld [smem:[#allocation40_spill]] }
  0xed   : > { %s3161_s15 = sld [smem:[#allocation28_spill]]  ;;  %s3162_s19 = sld [smem:[#allocation27_spill]] }
  0xee   : > { %s3163_s12 = sld [smem:[#allocation26_spill]]  ;;  %p3164_p7 = scmp.eq.s32.totalorder %s2095_s21, 0 }
  0xef   : > { %1503 = dma.hbm_to_vmem [thread:$0]  (!%p3157_p12), %s2555_s5, 128, %s385_s27, %s3158_s1  }
  0xf0   : > { %p3166_p10 = scmp.eq.s32.totalorder %s2243_s22, 0  ;;  %s3169_s0 = sld [smem:[#allocation58_spill]] }
  0xf1   : > { %p3170_p9 = scmp.lt.s32.totalorder %s2095_s21, 8 }
  0xf2   : > { %p172_p4 = scmp.lt.s32.totalorder %s3159_s14, 3  ;;  %s174_s17 = sadd.s32 1, %s3160_s16 }
  0xf3   : > { %s182_s29 = sadd.s32 1, %s3161_s15  ;;  %p175_p1 = scmp.lt.s32.totalorder %s174_s17, 3 }
  0xf4   : > { %s3228_s14 = smov (!%p172_p4, %s3159_s14), 3  ;;  %p189_p8 = scmp.ne.s32.totalorder %s3161_s15, %s3162_s19 }
  0xf5   : > { %p195_p3 = scmp.ne.s32.totalorder %s3162_s19, %s3163_s12  ;;  %s418_s30 = sand.u32 1, %s3161_s15  }
  0xf6   : > { %s3230_s17 = smov (!%p175_p1, %s174_s17), 3  ;;  %p2589_p2 = por %p189_p8, %p3164_p7 }
  0xf7   : > { %p2595_p0 = por %p195_p3, %p3166_p10  ;;  %s178_s27 = ssub.s32 %s3228_s14, %s3230_s17 }
  0xf8   : > { %s1420_s13 = smul.u32 40, %s418_s30  ;;  %s179_s2 = sor.u32 %s178_s27, %s2366_s9 }
  0xf9   : > { %s428_s10 = sadd.s32 %s2286_s8, %s3228_s14  ;;  %p180_p6 = scmp.eq.s32.totalorder %s179_s2, 0 }
  0xfa   : > { %s1382_s3 = sshll.u32 %s428_s10, 7  ;;  %s420_s1 = scalar_lea.vmem [#allocation10], %s1420_s13 }
  0xfb   : > { %s431_s16 = sshll.u32 %s420_s1, 4  ;;  %s3232_s15 = smov (!%p180_p6, %s3161_s15), %s182_s29  ;;  %s2609_s16 = int_to_ptr.vmem [resolvable:$true] %s431_s16 }
  0xfc   : > { %3168 = sst [smem:[#allocation53_spill]] %s3232_s15  ;;  %s2607_s4 = scalar_lea.hbm %s3169_s0, %s1382_s3 }
  0xfd   : > { %p2615_p5 = pnand %p3170_p9, %p2589_p2  ;;  %s3172_s9 = smul.u32 640, %s2091_s20 }
  0xfe   : > { %s3173_s29 = sld [smem:[#allocation60_spill]]  ;;  %s466_s27 = scalar_lea.vmem [#allocation13], %s2463_s11 }
  0xff   : > { %s473_s13 = sshll.u32 %s466_s27, 4  ;;  %s1817_s10 = scalar_lea.hbm %s2607_s4, 640  ;;  %s2627_s13 = int_to_ptr.vmem [resolvable:$true] %s473_s13 }
 0x100   : > { %p1818_p13 = scmp.ne.s32.totalorder %s2607_s4, %s1817_s10  ;;  %p1819_p11 = pneg %p2615_p5 }
 0x101   : > { %s1822_s1 = scalar_lea.hbm %s3169_s0, 5120  ;;  %p1823_p1 = scmp.lt.u32.totalorder %s2607_s4, %s3169_s0 }
 0x102   : > { %p1820_p12 = pnand %p1819_p11, %p1818_p13  ;;  %p1824_p8 = scmp.lt.u32.totalorder %s1822_s1, %s1817_s10 }
 0x103   : > { %p1826_p7 = scmp.lt.u32.totalorder %s1817_s10, %s2607_s4 }
 0x104   : > { %s3174_s2 = smov %s3173_s29  ;;  %s2624_s30 = scalar_lea.hbm %s3173_s29, %s3172_s9 }
 0x105   : > { %p1821_p4 = pneg %p1820_p12  ;;  %p1825_p3 = por %p1824_p8, %p1823_p1 }
 0x107   : > { %p1827_p2 = por %p1826_p7, %p1825_p3 }
 0x109   : > { %p1828_p10 = pnand %p1827_p2, %p1821_p4 }
 0x10b   : > { %1831 = shalt.err (!%p1828_p10)
}
 0x10c   : > { %s1832_s11 = scalar_lea.vmem %s2609_s16, 640  ;;  %s2105_s9 = smov [#allocation10]  }
 0x10d   : > { %p1833_p6 = scmp.ne.s32.totalorder %s2609_s16, %s1832_s11  ;;  %s1837_s14 = sshll.u32 %s2105_s9, 4  ;;  %s1838_s14 = int_to_ptr.vmem [resolvable:$false] %s1837_s14 }
 0x10e   : > { %s1839_s17 = scalar_lea.vmem %s1838_s14, 1280  ;;  %p1840_p12 = scmp.lt.s32.totalorder %s2609_s16, %s1838_s14 }
 0x10f   : > { %p1835_p9 = pnand %p1833_p6, %p1819_p11  ;;  %p1841_p1 = scmp.lt.s32.totalorder %s1839_s17, %s1832_s11 }
 0x111   : > { %p1836_p13 = pneg %p1835_p9  ;;  %p1842_p8 = por %p1841_p1, %p1840_p12 }
 0x113   : > { %p1843_p3 = pnand %p1842_p8, %p1836_p13 }
 0x115   : > { %1846 = shalt.err (!%p1843_p3)
}
 0x116   : > { %s3175_s29 = scalar_lea.sflag [#allocation9], %s2300_s7  ;;  %s1847_s27 = scalar_lea.hbm %s2624_s30, 640 }
 0x117   : > { %1509 = dma.hbm_to_vmem [thread:$0]  (!%p2615_p5), %s2607_s4, 640, %s2609_s16, %s3175_s29, %s3139_s6, %s3138_s26, %s3137_s23  }
 0x118   : > { %p1848_p11 = scmp.ne.s32.totalorder %s2624_s30, %s1847_s27  ;;  %p3176_p4 = scmp.ne.s32.totalorder %s3146_s18, 0 }
 0x119   : > { %s1852_s25 = scalar_lea.hbm %s3174_s2, 1280  ;;  %p1853_p6 = scmp.lt.u32.totalorder %s2624_s30, %s3174_s2 }
 0x11a   : > { %p3177_p7 = pneg %p3176_p4  ;;  %p1854_p9 = scmp.lt.u32.totalorder %s1852_s25, %s1847_s27 }
 0x11b   : > { %p1856_p12 = scmp.lt.u32.totalorder %s1847_s27, %s2624_s30 }
 0x11c   : > { %p1850_p2 = pnand %p1848_p11, %p3177_p7  ;;  %p1855_p13 = por %p1854_p9, %p1853_p6 }
 0x11e   : > { %p1851_p10 = pneg %p1850_p2  ;;  %p1857_p1 = por %p1856_p12, %p1855_p13 }
 0x120   : > { %p1858_p8 = pnand %p1857_p1, %p1851_p10 }
 0x122   : > { %1861 = shalt.err (!%p1858_p8)
}
 0x123   : > { %s1862_s6 = scalar_lea.vmem %s2627_s13, 640  ;;  %p3178_p3 = pmov %p3177_p7 }
 0x124   : > { %p1863_p5 = scmp.ne.s32.totalorder %s2627_s13, %s1862_s6  ;;  %s2106_s4 = smov [#allocation13]  }
 0x125   : > { %s1867_s16 = sshll.u32 %s2106_s4, 4  ;;  %s1868_s16 = int_to_ptr.vmem [resolvable:$false] %s1867_s16 }
 0x126   : > { %p1865_p11 = pnand %p1863_p5, %p3178_p3  ;;  %s1869_s19 = scalar_lea.vmem %s1868_s16, 1280 }
 0x127   : > { %p1870_p2 = scmp.lt.s32.totalorder %s2627_s13, %s1868_s16  ;;  %p1871_p6 = scmp.lt.s32.totalorder %s1869_s19, %s1862_s6 }
 0x128   : > { %p1866_p7 = pneg %p1865_p11 }
 0x129   : > { %p1872_p9 = por %p1871_p6, %p1870_p2 }
 0x12b   : > { %p1873_p13 = pnand %p1872_p9, %p1866_p7 }
 0x12d   : > { %1876 = shalt.err (!%p1873_p13)
}
 0x12e   : > { %s3179_s12 = scalar_lea.sflag [#allocation12], %s2300_s7  ;;  %s3180_s11 = sld [smem:[#allocation47_spill]] }
 0x12f   : > { %1515 = dma.hbm_to_vmem [thread:$0]  (!%p3176_p4), %s2624_s30, 640, %s2627_s13, %s3179_s12, %s3138_s26, %s3138_s26, %s3137_s23  }
 0x134   : > { %p3181_p10 = scmp.ne.s32.totalorder %s3180_s11, 0 }
 0x135   : > { %s3182_s9 = sld [smem:[#allocation32_spill]] (!%p3181_p10) }
 0x136   : > { %485 = sbr.rel (%p3181_p10) target bundleno = 731 (0x2db), region = 48  ;;  %s3183_s14 = sld [smem:[#allocation41_spill]] (!%p3181_p10) }
 0x13b   : > { %s2690_s17 = sand.u32 (!%p3181_p10), 1, %s3182_s9  }
 0x13c   : > { %s1426_s29 = smul.u32 (!%p3181_p10), 40, %s2690_s17  ;;  %s488_s27 = scalar_lea.sflag (!%p3181_p10), [#allocation3], %s2690_s17 }
 0x13d   : > { %p3184_p12 = scmp.ne.s32.totalorder %s3183_s14, 0 }
 0x13e   : > { %s2694_s18 = scalar_lea.vmem [#allocation2], %s1426_s29 }
 0x13f   : > { %2002 = dma.done.wait (%p3184_p12), %s488_s27, 640  }
 0x140   : > { %2004 = vsyncadd (%p3184_p12), %s488_s27, 4294966656  ;;  %s496_s7 = sand.u32 1, %s2243_s22   ;;  %s2701_s26 = scalar_lea.vmem [#allocation5], %s1426_s29 }
 0x141   : > { %s497_s23 = scalar_lea.sflag [#allocation6], %s496_s7 }
 0x142   : > { %2006 = dma.done.wait (%p3184_p12), %s497_s23, 768  }
 0x143   : > { %2008 = vsyncadd (%p3184_p12), %s497_s23, 4294966528  ;;  %s3185_s30 = sld [smem:[#allocation29_spill]]  ;;  %s2708_s13 = sshll.u32 %s2690_s17, 3 }
 0x144   : > { %s509_s25 = scalar_lea.vmem [#allocation7], %s2708_s13  ;;  %s515_s3 = scalar_lea.sflag [#allocation9], %s496_s7 }
 0x145   : > { %p3186_p4 = scmp.ne.s32.totalorder %s3132_s24, 0 }
 0x149   : > { %s516_s8 = sand.u32 1, %s3185_s30  }
 0x14a   : > { %s1427_s10 = smul.u32 40, %s516_s8 }
 0x14c   : > { %s2712_s1 = scalar_lea.vmem [#allocation8], %s1427_s10 }
 0x14d   : > { %2010 = dma.done.wait (%p3186_p4), %s515_s3, 640  }
 0x14e   : > { %2012 = vsyncadd (%p3186_p4), %s515_s3, 4294966656  ;;  %s3187_s22 = sld [smem:[#allocation27_spill]] }
 0x154   : > { %s525_s6 = sand.u32 1, %s3187_s22  }
 0x155   : > { %s2719_s4 = smul.u32 40, %s525_s6 }
 0x157   : > { %s527_s16 = scalar_lea.vmem [#allocation10], %s2719_s4 }
 0x158   : > { %2014 = dma.done.wait (%p2595_p0), %s515_s3, 640  }
 0x159   : > { %2016 = vsyncadd (%p2595_p0), %s515_s3, 4294966656  ;;  %s3188_s19 = sld [smem:[#allocation52_spill]]  ;;  %s534_s12 = sand.u32 1, %s2035_s28  }
 0x15a   : > { %s2727_s11 = smul.u32 40, %s534_s12  ;;  %s533_s24 = scalar_lea.sflag [#allocation12], %s496_s7 }
 0x15c   : > { %s2730_s9 = scalar_lea.vmem [#allocation11], %s2727_s11 }
 0x15f   : > { %p3189_p1 = scmp.ne.s32.totalorder %s3188_s19, 0 }
 0x161   : > { %2018 = dma.done.wait (%p3189_p1), %s533_s24, 1280  }
 0x162   : > { %2020 = vsyncadd (%p3189_p1), %s533_s24, 4294966016  ;;  %v620_v0 = vlaneseq  ;;  %v2107_v2 = vmov 0.0   ;;  %v2743_v4 = vld [vmem:[%s2694_s18] sm:$0xff]  ;;  %v2746_v5 = vld [vmem:[%s2694_s18 + $0x8] sm:$0xff]  ;;  %s2108_s5 = smov 127   ;;  %s3190_s14 = sld [smem:[#allocation34_spill]] }
 0x163   : > { %v2749_v6 = vld [vmem:[%s2694_s18 + $0x10] sm:$0xff]  ;;  %644 = vrot.lane.b32.xlu0 %v2743_v4, %s2108_s5  ;;  %v931_v7 = vmul.f32 20.0, %v2743_v4  ;;  %v932_v8 = vadd.f32 200.0, %v2746_v5  ;;  %v2757_v10 = vld [vmem:[%s2694_s18 + $0x18] sm:$0xff]  ;;  %v2760_v13 = vld [vmem:[%s2712_s1 + $0x17] sm:$0x1] }
 0x164   : > { %v2736_v1 = vand.u32 127, %v620_v0  ;;  %764 = vrot.lane.b32.xlu1 %v2749_v6, %s2108_s5  ;;  %v934_v9 = vadd.f32 500.0, %v2749_v6  ;;  %v673_v15 = vld [vmem:[%s2712_s1 + $0x7] sm:$0x1]  ;;  %v955_v16 = vadd.f32 500.0, %v2760_v13  ;;  %v2769_v17 = vld [vmem:[%s2694_s18 + $0x20] sm:$0xff] }
 0x165   : > { %v933_v11 = vmul.f32 1500.0, %v932_v8  ;;  %v2771_v19 = vshrl.u32 %v620_v0, 7  ;;  %v954_v20 = vmul.f32 20.0, %v673_v15  ;;  %v958_v21 = vld [vmem:[%s527_s16] sm:$0x1]  ;;  %s2109_s29 = smov 1   ;;  %v674_v54 = vsub.f32 %v2743_v4, %v673_v15 }
 0x166   : > { %vm624_vm0 = vcmp.lt.s32.totalorder %v2736_v1, 127  ;;  %v935_v12 = vmul.f32 1500.0, %v934_v9  ;;  %v1404_v22 = vld [vmem:[%s527_s16 + $0x10] sm:$0x1]  ;;  %v956_v23 = vmul.f32 1500.0, %v955_v16  ;;  %v959_v26 = vmul.f32 20.0, %v958_v21 }
 0x167   : > { %v2740_v3 = vsel %vm624_vm0, 1.0, %v2107_v2  ;;  %704 = vrot.lane.b32.xlu0 %v2746_v5, %s2108_s5  ;;  %v2764_v14 = vmul.f32 %v933_v11, %v931_v7  ;;  %v970_v24 = vsub.s32 0, %v2771_v19  ;;  %v962_v27 = vadd.f32 500.0, %v1404_v22  ;;  %v631_v48 = vld [vmem:[%s2701_s26] sm:$0xff]  ;;  %v1393_v52 = vld [vmem:[%s2701_s26 + $0x8] sm:$0xff]  ;;  %s2829_s18 = scalar_lea.vmem [#allocation13], %s2727_s11 }
 0x168   : > { %824 = vrot.lane.b32.xlu1 %v2757_v10, %s2108_s5  ;;  %v939_v18 = vmul.f32 %v935_v12, %v931_v7  ;;  %v957_v25 = vmul.f32 %v956_v23, %v954_v20  ;;  %vm973_vm1 = vcmp.eq.s32.totalorder %v2771_v19, 0  ;;  %s1389_s27 = sshll.u32 %s3190_s14, 3  ;;  %vm967_vm2 = vcmp.eq.s32.totalorder %v2771_v19, 7  ;;  %v1394_v55 = vld [vmem:[%s2712_s1 + $0xf] sm:$0x1]  ;;  %s605_s7 = scalar_lea.vmem [#allocation14], %s2708_s13 }
 0x169   : > { %v963_v29 = vmul.f32 1500.0, %v962_v27  ;;  %v979_v35 = vstv %s1389_s27  ;;  %v659_v46 = vrot.slane %v2743_v4, 7  ;;  %vm627_vm5 = vcmp.ge.s32.totalorder %v2771_v19, 1  ;;  %v1400_v11 = vld [vmem:[%s2712_s1 + $0x1f] sm:$0x1]  ;;  %s3191_s23 = sld [smem:[#allocation35_spill]] }
 0x16a   : > { %v966_v28 = vrot.slane %v939_v18, 7  ;;  %v977_v30 = vrot.slane %v957_v25, %v970_v24  ;;  %v965_v34 = vrot.slane %v939_v18, 1  ;;  %v980_v36 = vadd.s32 %v979_v35, %v2771_v19  ;;  %v1402_v35 = vld [vmem:[%s2701_s26 + $0x20] sm:$0xff]  ;;  %s1099_s10 = sshll.u32 %s605_s7, 4  ;;  %s3193_s22 = sld [smem:[#allocation61_spill]]  ;;  %s2877_s10 = int_to_ptr.vmem [resolvable:$true] %s1099_s10 }
 0x16b   : > { %884 = vrot.lane.b32.xlu0 %v2769_v17, %s2108_s5  ;;  %v964_v31 = vmul.f32 %v963_v29, %v959_v26  ;;  %v660_v47 = vsub.f32 %v2743_v4, %v659_v46  ;;  %v719_v50 = vrot.slane %v2746_v5, 7  ;;  %v2795_v51 = vsel %vm627_vm5, 1.0, %v2107_v2  ;;  %v1396_v2 = vld [vmem:[%s2701_s26 + $0x10] sm:$0xff]  ;;  %s1079_s4 = scalar_lea.sflag [#allocation4], %s2690_s17  ;;  %s1877_s16 = scalar_lea.vmem %s2877_s10, 128 }
 0x16c   : > { %940 = vrot.lane.b32.xlu1 %v2764_v14, %s2108_s5  ;;  %v978_v32 = vsel %vm973_vm1, %v977_v30, %v966_v28  ;;  %vm984_vm3 = vcmp.eq.s32.totalorder %v980_v36, 31  ;;  %vm981_vm4 = vcmp.eq.s32.totalorder %v980_v36, 0  ;;  %v632_v53 = vsub.f32 %v2743_v4, %v631_v48  ;;  %v1014_v36 = vld [vmem:[%s2730_s9] sm:$0xff]  ;;  %p1878_p0 = scmp.ne.s32.totalorder %s2877_s10, %s1877_s16  ;;  %s2110_s19 = smov [#allocation14]  }
 0x16d   : > { %v971_v33 = vrot.slane %v964_v31, %v970_v24  ;;  %v985_v37 = vsub.f32 %v939_v18, %v978_v32  ;;  %v661_v49 = vmul.f32 %v660_v47, %v660_v47  ;;  %v692_v57 = vsub.f32 %v2746_v5, %v1393_v52  ;;  %v1021_v52 = vld [vmem:[%s2829_s18 + $0x10] sm:$0xff]  ;;  %s1881_s12 = sshll.u32 %s2110_s19, 4  ;;  %s1882_s12 = int_to_ptr.vmem [resolvable:$false] %s1881_s12 }
 0x16e   : > { %v720_v58 = vsub.f32 %v2746_v5, %v719_v50  ;;  %v633_v59 = vmul.f32 %v632_v53, %v632_v53  ;;  %v675_v60 = vmul.f32 %v674_v54, %v674_v54  ;;  %v735_v61 = vsub.f32 %v2746_v5, %v1394_v55  ;;  %v1016_v50 = vld [vmem:[%s2730_s9 + $0x10] sm:$0xff]  ;;  %s1883_s11 = scalar_lea.vmem %s1882_s12, 256  ;;  %p1884_p11 = scmp.lt.s32.totalorder %s2877_s10, %s1882_s12 }
 0x16f   : > { %942 = vrot.lane.b32.xlu0 %v2764_v14, %s2109_s29  ;;  %v972_v38 = vsel %vm967_vm2, %v971_v33, %v965_v34  ;;  %v986_v40 = vmul.f32 2.5, %v985_v37  ;;  %v662_v56 = vmul.f32 %v2795_v51, %v661_v49  ;;  %vm676_vm6 = vcmask 1040384   ;;  %v1015_v37 = vld [vmem:[%s2730_s9 + $0x8] sm:$0xff]  ;;  %s1407_s30 = sshll.u32 %s3191_s23, 2  ;;  %p1885_p7 = scmp.lt.s32.totalorder %s1883_s11, %s1877_s16 }
 0x170   : > { %v982_v39 = vsub.f32 %v972_v38, %v939_v18  ;;  %v987_v41 = vsub.f32 %v972_v38, %v978_v32  ;;  %v693_v62 = vmul.f32 %v692_v57, %v692_v57  ;;  %v721_v63 = vmul.f32 %v720_v58, %v720_v58  ;;  %v1019_v38 = vld [vmem:[%s2829_s18] sm:$0xff]  ;;  %v1017_v58 = vld [vmem:[%s2730_s9 + $0x18] sm:$0xff]  ;;  %s2874_s8 = sadd.s32 %s3190_s14, %s1407_s30 }
 0x171   : > { %v779_v0 = vrot.slane %v2749_v6, 7  ;;  %v677_v7 = vsel %vm676_vm6, %v675_v60, 0.0  ;;  %v736_v8 = vmul.f32 %v735_v61, %v735_v61  ;;  %v795_v9 = vsub.f32 %v2749_v6, %v2760_v13  ;;  %v1399_v13 = vld [vmem:[%s2701_s26 + $0x18] sm:$0xff]  ;;  %s3192_s26 = sld [smem:[#allocation42_spill]]  ;;  %p1886_p2 = por %p1885_p7, %p1884_p11 }
 0x172   : > { %v983_v42 = vmul.f32 2.5, %v982_v39  ;;  %v988_v43 = vmul.f32 1.25, %v987_v41  ;;  %v722_v12 = vmul.f32 %v2795_v51, %v721_v63  ;;  %v752_v15 = vsub.f32 %v2749_v6, %v1396_v2  ;;  %v1020_v39 = vld [vmem:[%s2829_s18 + $0x8] sm:$0xff] }
 0x173   : > { %v780_v16 = vsub.f32 %v2749_v6, %v779_v0  ;;  %v737_v18 = vsel %vm676_vm6, %v736_v8, 0.0  ;;  %v796_v20 = vmul.f32 %v795_v9, %v795_v9  ;;  %v855_v21 = vsub.f32 %v2757_v10, %v1400_v11 }
 0x174   : > { %v989_v44 = vsel %vm984_vm3, %v986_v40, %v988_v43  ;;  %v753_v22 = vmul.f32 %v752_v15, %v752_v15  ;;  %v839_v24 = vrot.slane %v2757_v10, 7  ;;  %v812_v28 = vsub.f32 %v2757_v10, %v1399_v13  ;;  %v1403_v13 = vld [vmem:[%s2712_s1 + $0x27] sm:$0x1] }
 0x175   : > { %v2787_v45 = vsel %vm981_vm4, %v983_v42, %v989_v44  ;;  %v781_v23 = vmul.f32 %v780_v16, %v780_v16  ;;  %v797_v25 = vsel %vm676_vm6, %v796_v20, 0.0  ;;  %v856_v26 = vmul.f32 %v855_v21, %v855_v21  ;;  %v1018_v21 = vld [vmem:[%s2730_s9 + $0x20] sm:$0xff] }
 0x176   : > { %v840_v29 = vsub.f32 %v2757_v10, %v839_v24  ;;  %v813_v31 = vmul.f32 %v812_v28, %v812_v28  ;;  %v899_v34 = vrot.slane %v2769_v17, 7  ;;  %v872_v44 = vsub.f32 %v2769_v17, %v1402_v35 }
 0x177   : > { %v782_v27 = vmul.f32 %v2795_v51, %v781_v23  ;;  %v857_v30 = vsel %vm676_vm6, %v856_v26, 0.0  ;;  %v1024_v46 = vsub.f32 %v1014_v36, %v1019_v38  ;;  %v1025_v47 = vsub.f32 %v1015_v37, %v1020_v39  ;;  %p3194_p8 = scmp.ne.s32.totalorder %s3192_s26, 0 }
 0x178   : > { %v841_v32 = vmul.f32 %v840_v29, %v840_v29  ;;  %v900_v43 = vsub.f32 %v2769_v17, %v899_v34  ;;  %v1026_v60 = vsub.f32 %v1016_v50, %v1021_v52  ;;  %vm1035_vm7 = vcmask 523264  }
 0x179   : > { %v1030_v61 = vmul.f32 %v1024_v46, %v1024_v46  ;;  %vm947_vm8 = vcmp.eq.s32.totalorder %v2736_v1, 127  ;;  %vm944_vm9 = vcmp.eq.s32.totalorder %v2736_v1, 0  ;;  %p1879_p5 = pnand %p1878_p0, %p3194_p8 }
 0x17a   : > { %v842_v33 = vmul.f32 %v2795_v51, %v841_v32  ;;  %v901_v57 = vmul.f32 %v900_v43, %v900_v43 }
 0x17b   : > { %v1036_v15 = vsel %vm1035_vm7, %v1030_v61, 0.0  ;;  %p1880_p3 = pneg %p1879_p5 }
 0x17c   : > { %v902_v8 = vmul.f32 %v2795_v51, %v901_v57 }
 0x17d   : > { %p1887_p6 = pnand %p1886_p2, %p1880_p3 }
 0x18e   : > { %663 = vadd.xlane.f32.xlu0 %v662_v56 }
 0x190   : > { %634 = vadd.xlane.f32.xlu1 %v633_v59  ;;  %v1022_v59 = vld [vmem:[%s2829_s18 + $0x18] sm:$0xff] }
 0x191   : > { %v1027_v9 = vsub.f32 %v1017_v58, %v1022_v59 }
 0x192   : > { %694 = vadd.xlane.f32.xlu0 %v693_v62  ;;  %v1031_v62 = vmul.f32 %v1025_v47, %v1025_v47 }
 0x193   : > { %v1033_v29 = vmul.f32 %v1027_v9, %v1027_v9 }
 0x194   : > { %678 = vadd.xlane.f32.xlu1 %v677_v7  ;;  %v1037_v16 = vsel %vm1035_vm7, %v1031_v62, 0.0 }
 0x196   : > { %723 = vadd.xlane.f32.xlu0 %v722_v12  ;;  %v1032_v12 = vmul.f32 %v1026_v60, %v1026_v60 }
 0x198   : > { %738 = vadd.xlane.f32.xlu1 %v737_v18 }
 0x19a   : > { %754 = vadd.xlane.f32.xlu0 %v753_v22  ;;  %v1023_v22 = vld [vmem:[%s2829_s18 + $0x20] sm:$0xff] }
 0x19b   : > { %v1028_v28 = vsub.f32 %v1018_v21, %v1023_v22 }
 0x19c   : > { %798 = vadd.xlane.f32.xlu1 %v797_v25  ;;  %v1038_v25 = vadd.f32 %v1037_v16, %v1036_v15 }
 0x19d   : > { %v1034_v39 = vmul.f32 %v1028_v28, %v1028_v28 }
 0x19e   : > { %783 = vadd.xlane.f32.xlu0 %v782_v27  ;;  %v936_v27 = vld [vmem:[%s509_s25] sm:$0xff]  ;;  %s3073_s25 = sshll.u32 %s2874_s8, 7 }
 0x19f   : > { %v937_v36 = vmul.f32 20.0, %v936_v27  ;;  %s1097_s6 = scalar_lea.hbm %s3193_s22, %s3073_s25 }
 0x1a0   : > { %858 = vadd.xlane.f32.xlu1 %v857_v30  ;;  %v1039_v30 = vsel %vm1035_vm7, %v1032_v12, 0.0 }
 0x1a1   : > { %v1040_v37 = vadd.f32 %v1039_v30, %v1038_v25 }
 0x1a2   : > { %814 = vadd.xlane.f32.xlu0 %v813_v31 }
 0x1a6   : > { %843 = vadd.xlane.f32.xlu0 %v842_v33 }
 0x1d5   : > { %v645_v40 = vpop.permute.xlu0 %644 }
 0x1d6   : > { %v765_v41 = vpop.permute.xlu1 %764  ;;  %v646_v42 = vsub.f32 %v645_v40, %v2743_v4  ;;  %v873_v4 = vmul.f32 %v872_v44, %v872_v44  ;;  %v1041_v40 = vsel %vm1035_vm7, %v1033_v29, 0.0 }
 0x1d7   : > { %v766_v49 = vsub.f32 %v765_v41, %v2749_v6  ;;  %v1042_v46 = vadd.f32 %v1041_v40, %v1040_v37 }
 0x1d8   : > { %v647_v48 = vmul.f32 %v646_v42, %v646_v42 }
 0x1d9   : > { %v705_v53 = vpop.permute.xlu0 %704  ;;  %v767_v0 = vmul.f32 %v766_v49, %v766_v49 }
 0x1da   : > { %v825_v54 = vpop.permute.xlu1 %824  ;;  %v706_v55 = vsub.f32 %v705_v53, %v2746_v5  ;;  %v648_v56 = vmul.f32 %v2740_v3, %v647_v48 }
 0x1db   : > { %v826_v6 = vsub.f32 %v825_v54, %v2757_v10  ;;  %v768_v20 = vmul.f32 %v2740_v3, %v767_v0 }
 0x1dc   : > { %v707_v63 = vmul.f32 %v706_v55, %v706_v55  ;;  %649 = vadd.xlane.f32.xlu0 %v648_v56 }
 0x1dd   : > { %v885_v2 = vpop.permute.xlu0 %884  ;;  %v827_v10 = vmul.f32 %v826_v6, %v826_v6 }
 0x1de   : > { %v941_v7 = vpop.permute.xlu1 %940  ;;  %v708_v5 = vmul.f32 %v2740_v3, %v707_v63  ;;  %v886_v18 = vsub.f32 %v885_v2, %v2769_v17 }
 0x1df   : > { %v945_v11 = vsub.f32 %v941_v7, %v2764_v14  ;;  %v828_v34 = vmul.f32 %v2740_v3, %v827_v10 }
 0x1e0   : > { %709 = vadd.xlane.f32.xlu1 %v708_v5  ;;  %874 = vadd.xlane.f32.xlu0 %v873_v4  ;;  %v887_v31 = vmul.f32 %v886_v18, %v886_v18 }
 0x1e1   : > { %v943_v51 = vpop.permute.xlu0 %942  ;;  %v946_v26 = vmul.f32 160.0, %v945_v11 }
 0x1e2   : > { %v948_v23 = vsub.f32 %v2764_v14, %v943_v51  ;;  %v950_v24 = vsub.f32 %v941_v7, %v943_v51  ;;  %v915_v14 = vsub.f32 %v2769_v17, %v1403_v13  ;;  %v888_v41 = vmul.f32 %v2740_v3, %v887_v31 }
 0x1e3   : > { %v1043_v17 = vsel %vm1035_vm7, %v1034_v39, 0.0 }
 0x1e4   : > { %v949_v32 = vmul.f32 160.0, %v948_v23  ;;  %v951_v33 = vmul.f32 80.0, %v950_v24  ;;  %769 = vadd.xlane.f32.xlu1 %v768_v20  ;;  %903 = vadd.xlane.f32.xlu0 %v902_v8  ;;  %v916_v43 = vmul.f32 %v915_v14, %v915_v14  ;;  %v1044_v48 = vadd.f32 %v1043_v17, %v1042_v46 }
 0x1e6   : > { %v952_v35 = vsel %vm947_vm8, %v949_v32, %v951_v33  ;;  %v917_v1 = vsel %vm676_vm6, %v916_v43, 0.0 }
 0x1e7   : > { %v953_v38 = vsel %vm944_vm9, %v946_v26, %v952_v35 }
 0x1e8   : > { %829 = vadd.xlane.f32.xlu1 %v828_v34  ;;  %v991_v42 = vadd.f32 %v2787_v45, %v953_v38 }
 0x1ea   : > { %v992_v44 = vsub.f32 %v937_v36, %v991_v42  ;;  %993 = vst [vmem:[%s605_s7] sm:$0xff] %v991_v42 }
 0x1ec   : > { %889 = vadd.xlane.f32.xlu1 %v888_v41  ;;  %v994_v47 = vmul.f32 %v992_v44, %v992_v44  ;;  %v1004_v49 = vand.u32 2147483647, %v992_v44 }
 0x1ee   : > { %995 = vadd.xlane.f32.xlu0 %v994_v47 }
 0x1f0   : > { %918 = vadd.xlane.f32.xlu1 %v917_v1 }
 0x1f2   : > { %1045 = vadd.xlane.f32.xlu0 %v1044_v48 }
 0x1f4   : > { %1005 = vmax.xlane.f32.xlu1 %v1004_v49 }
 0x21b   : > { %v664_v56 = vpop.xlane.xlu0 %663 }
 0x21d   : > { %v635_v3 = vpop.xlane.xlu1 %634 }
 0x21e   : > { %v636_v45 = vrot.slane %v635_v3, 4 }
 0x21f   : > { %v695_v57 = vpop.xlane.xlu0 %694 }
 0x220   : > { %v637_v50 = vadd.f32 %v636_v45, %v635_v3 }
 0x222   : > { %v638_v52 = vrot.slane %v637_v50, 2 }
 0x223   : > { %v724_v4 = vpop.xlane.xlu0 %723 }
 0x224   : > { %v639_v53 = vadd.f32 %v638_v52, %v637_v50 }
 0x226   : > { %v640_v54 = vrot.slane %v639_v53, 1 }
 0x228   : > { %v641_v55 = vadd.f32 %v640_v54, %v639_v53 }
 0x22a   : > { %1430 = vpush %v641_v55 }
 0x22b   : > { %1890 = shalt.err (!%p1887_p6)
}
 0x22c   : > { %s1891_s24 = scalar_lea.hbm %s1097_s6, 128  ;;  %s1895_s29 = scalar_lea.hbm %s3193_s22, 1024 }
 0x22d   : > { %p1892_p9 = scmp.ne.s32.totalorder %s1097_s6, %s1891_s24  ;;  %p1896_p12 = scmp.lt.u32.totalorder %s1097_s6, %s3193_s22 }
 0x22e   : > { %p1897_p4 = scmp.lt.u32.totalorder %s1895_s29, %s1891_s24  ;;  %p1899_p0 = scmp.lt.u32.totalorder %s1891_s24, %s1097_s6 }
 0x22f   : > { %p1893_p13 = pnand %p1892_p9, %p3194_p8 }
 0x230   : > { %p1898_p1 = por %p1897_p4, %p1896_p12 }
 0x231   : > { %p1894_p10 = pneg %p1893_p13 }
 0x232   : > { %p1900_p5 = por %p1899_p0, %p1898_p1 }
 0x234   : > { %p1901_p3 = pnand %p1900_p5, %p1894_p10 }
 0x236   : > { %1904 = shalt.err (!%p1901_p3)
}
 0x237   : > { %1490 = dma.vmem_to_hbm [thread:$0]  (%p3194_p8), %s2877_s10, 128, %s1097_s6, %s1079_s4   ;;  %v755_v58 = vpop.xlane.xlu0 %754  ;;  %v679_v59 = vpop.xlane.xlu1 %678  ;;  %v665_v61 = vrot.slane %v664_v56, 4  ;;  %v696_v62 = vrot.slane %v695_v57, 4  ;;  %v725_v15 = vrot.slane %v724_v4, 4  ;;  %vm1057_vm10 = vcmp.eq.s32.totalorder %v2771_v19, 1 }
 0x238   : > { %v680_v63 = vrot.slane %v679_v59, 4  ;;  %v756_v18 = vrot.slane %v755_v58, 4  ;;  %p928_p11 = scmp.gt.s32.totalorder %s3190_s14, 0  ;;  %p1029_p7 = scmp.eq.s32.totalorder %s3190_s14, 0  ;;  %vm1061_vm11 = vcmp.eq.s32.totalorder %v2771_v19, 2  ;;  %vm1065_vm12 = vcmp.eq.s32.totalorder %v2771_v19, 3 }
 0x239   : > { %v666_v2 = vadd.f32 %v665_v61, %v664_v56  ;;  %v697_v7 = vadd.f32 %v696_v62, %v695_v57  ;;  %v726_v51 = vadd.f32 %v725_v15, %v724_v4  ;;  %vm1069_vm13 = vcmp.eq.s32.totalorder %v2771_v19, 4  ;;  %s3196_s14 = sld [smem:[#allocation62_spill]] }
 0x23a   : > { %v681_v5 = vadd.f32 %v680_v63, %v679_v59  ;;  %v757_v27 = vadd.f32 %v756_v18, %v755_v58  ;;  %vm1073_vm14 = vcmp.eq.s32.totalorder %v2771_v19, 5 }
 0x23b   : > { %v784_v60 = vpop.xlane.xlu0 %783  ;;  %v739_v0 = vpop.xlane.xlu1 %738  ;;  %v667_v8 = vrot.slane %v666_v2, 2  ;;  %v698_v9 = vrot.slane %v697_v7, 2  ;;  %v727_v33 = vrot.slane %v726_v51, 2 }
 0x23c   : > { %v682_v16 = vrot.slane %v681_v5, 2  ;;  %v740_v10 = vrot.slane %v739_v0, 4  ;;  %v785_v13 = vrot.slane %v784_v60, 4  ;;  %v758_v41 = vrot.slane %v757_v27, 2 }
 0x23d   : > { %v668_v20 = vadd.f32 %v667_v8, %v666_v2  ;;  %v699_v22 = vadd.f32 %v698_v9, %v697_v7  ;;  %v728_v45 = vadd.f32 %v727_v33, %v726_v51 }
 0x23e   : > { %v683_v23 = vadd.f32 %v682_v16, %v681_v5  ;;  %v741_v24 = vadd.f32 %v740_v10, %v739_v0  ;;  %v786_v36 = vadd.f32 %v785_v13, %v784_v60  ;;  %v759_v59 = vadd.f32 %v758_v41, %v757_v27 }
 0x23f   : > { %v815_v6 = vpop.xlane.xlu0 %814  ;;  %v799_v11 = vpop.xlane.xlu1 %798  ;;  %v669_v29 = vrot.slane %v668_v20, 1  ;;  %v700_v32 = vrot.slane %v699_v22, 1  ;;  %v729_v7 = vrot.slane %v728_v45, 1 }
 0x240   : > { %v800_v21 = vrot.slane %v799_v11, 4  ;;  %v816_v31 = vrot.slane %v815_v6, 4  ;;  %v684_v14 = vrot.slane %v683_v23, 1  ;;  %v742_v35 = vrot.slane %v741_v24, 2 }
 0x241   : > { %v670_v44 = vadd.f32 %v669_v29, %v668_v20  ;;  %v701_v1 = vadd.f32 %v700_v32, %v699_v22  ;;  %v787_v50 = vrot.slane %v786_v36, 2  ;;  %v730_v13 = vadd.f32 %v729_v7, %v728_v45 }
 0x242   : > { %v801_v30 = vadd.f32 %v800_v21, %v799_v11  ;;  %v817_v17 = vadd.f32 %v816_v31, %v815_v6  ;;  %v685_v3 = vadd.f32 %v684_v14, %v683_v23  ;;  %v743_v56 = vadd.f32 %v742_v35, %v741_v24 }
 0x243   : > { %v844_v12 = vpop.xlane.xlu0 %843  ;;  %v859_v25 = vpop.xlane.xlu1 %858  ;;  %v760_v21 = vrot.slane %v759_v59, 1 }
 0x244   : > { %v860_v37 = vrot.slane %v859_v25, 4  ;;  %v845_v38 = vrot.slane %v844_v12, 4  ;;  %v802_v46 = vrot.slane %v801_v30, 2  ;;  %v818_v60 = vrot.slane %v817_v17, 2 }
 0x245   : > { %v744_v18 = vrot.slane %v743_v56, 1  ;;  %v761_v14 = vadd.f32 %v760_v21, %v759_v59 }
 0x246   : > { %v861_v52 = vadd.f32 %v860_v37, %v859_v25  ;;  %v846_v53 = vadd.f32 %v845_v38, %v844_v12  ;;  %v803_v63 = vadd.f32 %v802_v46, %v801_v30  ;;  %v788_v12 = vadd.f32 %v787_v50, %v786_v36 }
 0x247   : > { %v819_v51 = vadd.f32 %v818_v60, %v817_v17  ;;  %v745_v33 = vadd.f32 %v744_v18, %v743_v56 }
 0x248   : > { %v862_v5 = vrot.slane %v861_v52, 2  ;;  %v847_v8 = vrot.slane %v846_v53, 2  ;;  %v804_v22 = vrot.slane %v803_v63, 1 }
 0x249   : > { %v820_v37 = vrot.slane %v819_v51, 1 }
 0x24a   : > { %v848_v29 = vadd.f32 %v847_v8, %v846_v53  ;;  %v863_v30 = vadd.f32 %v862_v5, %v861_v52  ;;  %v805_v36 = vadd.f32 %v804_v22, %v803_v63 }
 0x24b   : > { %v821_v45 = vadd.f32 %v820_v37, %v819_v51 }
 0x24c   : > { %v849_v46 = vrot.slane %v848_v29, 1  ;;  %v864_v17 = vrot.slane %v863_v30, 1 }
 0x25b   : > { %s1431_s7 = spop %1430 }
 0x269   : > { %v650_v26 = vpop.xlane.xlu0 %649 }
 0x26a   : > { %v651_v28 = vrot.slane %v650_v26, 4 }
 0x26c   : > { %v652_v34 = vadd.f32 %v651_v28, %v650_v26  ;;  %v789_v28 = vrot.slane %v788_v12, 1 }
 0x26d   : > { %v710_v39 = vpop.xlane.xlu1 %709  ;;  %v875_v40 = vpop.xlane.xlu0 %874 }
 0x26e   : > { %v653_v42 = vrot.slane %v652_v34, 2  ;;  %v711_v43 = vrot.slane %v710_v39, 4  ;;  %v876_v47 = vrot.slane %v875_v40, 4 }
 0x270   : > { %v712_v48 = vadd.f32 %v711_v43, %v710_v39  ;;  %v654_v49 = vadd.f32 %v653_v42, %v652_v34  ;;  %v877_v61 = vadd.f32 %v876_v47, %v875_v40 }
 0x271   : > { %v770_v54 = vpop.xlane.xlu1 %769  ;;  %v904_v55 = vpop.xlane.xlu0 %903 }
 0x272   : > { %v713_v57 = vrot.slane %v712_v48, 2  ;;  %v771_v4 = vrot.slane %v770_v54, 4  ;;  %v655_v58 = vrot.slane %v654_v49, 1  ;;  %v905_v62 = vrot.slane %v904_v55, 4 }
 0x273   : > { %v878_v20 = vrot.slane %v877_v61, 2 }
 0x274   : > { %v772_v0 = vadd.f32 %v771_v4, %v770_v54  ;;  %v656_v6 = vadd.f32 %v655_v58, %v654_v49  ;;  %v714_v2 = vadd.f32 %v713_v57, %v712_v48  ;;  %v906_v11 = vadd.f32 %v905_v62, %v904_v55 }
 0x275   : > { %v830_v9 = vpop.xlane.xlu1 %829  ;;  %v879_v38 = vadd.f32 %v878_v20, %v877_v61  ;;  %v850_v4 = vadd.f32 %v849_v46, %v848_v29  ;;  %v865_v58 = vadd.f32 %v864_v17, %v863_v30 }
 0x276   : > { %v773_v15 = vrot.slane %v772_v0, 2  ;;  %v831_v16 = vrot.slane %v830_v9, 4  ;;  %1432 = vpush %v656_v6  ;;  %v715_v10 = vrot.slane %v714_v2, 1  ;;  %v907_v26 = vrot.slane %v906_v11, 2 }
 0x277   : > { %1434 = vpush %v670_v44  ;;  %v790_v44 = vadd.f32 %v789_v28, %v788_v12  ;;  %v880_v50 = vrot.slane %v879_v38, 1 }
 0x278   : > { %v832_v23 = vadd.f32 %v831_v16, %v830_v9  ;;  %1436 = vpush %v685_v3  ;;  %v716_v24 = vadd.f32 %v715_v10, %v714_v2  ;;  %v774_v25 = vadd.f32 %v773_v15, %v772_v0  ;;  %v908_v47 = vadd.f32 %v907_v26, %v906_v11 }
 0x279   : > { %1438 = vpush %v701_v1  ;;  %v890_v27 = vpop.xlane.xlu1 %889  ;;  %v881_v6 = vadd.f32 %v880_v50, %v879_v38 }
 0x27a   : > { %v833_v31 = vrot.slane %v832_v23, 2  ;;  %v891_v32 = vrot.slane %v890_v27, 4  ;;  %1440 = vpush %v716_v24  ;;  %v775_v34 = vrot.slane %v774_v25, 1  ;;  %v909_v60 = vrot.slane %v908_v47, 1 }
 0x27b   : > { %1442 = vpush %v730_v13  ;;  %v996_v35 = vpop.xlane.xlu0 %995 }
 0x27c   : > { %v892_v39 = vadd.f32 %v891_v32, %v890_v27  ;;  %1444 = vpush %v745_v33  ;;  %v997_v40 = vrot.slane %v996_v35, 4  ;;  %v776_v41 = vadd.f32 %v775_v34, %v774_v25  ;;  %v834_v42 = vadd.f32 %v833_v31, %v832_v23 }
 0x27d   : > { %1446 = vpush %v761_v14  ;;  %v919_v43 = vpop.xlane.xlu1 %918  ;;  %v910_v16 = vadd.f32 %v909_v60, %v908_v47 }
 0x27e   : > { %v893_v1 = vrot.slane %v892_v39, 2  ;;  %v920_v48 = vrot.slane %v919_v43, 4  ;;  %v998_v49 = vadd.f32 %v997_v40, %v996_v35  ;;  %1448 = vpush %v776_v41  ;;  %v835_v3 = vrot.slane %v834_v42, 1 }
 0x27f   : > { %1450 = vpush %v790_v44  ;;  %v1046_v52 = vpop.xlane.xlu0 %1045 }
 0x280   : > { %v921_v53 = vadd.f32 %v920_v48, %v919_v43  ;;  %v999_v54 = vrot.slane %v998_v49, 2  ;;  %1452 = vpush %v805_v36  ;;  %v836_v55 = vadd.f32 %v835_v3, %v834_v42  ;;  %v1047_v56 = vrot.slane %v1046_v52, 4 }
 0x281   : > { %1454 = vpush %v821_v45  ;;  %v1006_v57 = vpop.xlane.xlu1 %1005  ;;  %v894_v59 = vadd.f32 %v893_v1, %v892_v39 }
 0x282   : > { %v922_v61 = vrot.slane %v921_v53, 2  ;;  %v1007_v62 = vrot.slane %v1006_v57, 4  ;;  %1456 = vpush %v836_v55  ;;  %v1048_v63 = vadd.f32 %v1047_v56, %v1046_v52  ;;  %v1000_v0 = vadd.f32 %v999_v54, %v998_v49 }
 0x283   : > { %1458 = vpush %v850_v4  ;;  %v895_v2 = vrot.slane %v894_v59, 1 }
 0x284   : > { %v1008_v7 = vmax.f32 %v1006_v57, %v1007_v62  ;;  %1460 = vpush %v865_v58  ;;  %v1049_v5 = vrot.slane %v1048_v63, 2  ;;  %v923_v8 = vadd.f32 %v922_v61, %v921_v53  ;;  %v1001_v9 = vrot.slane %v1000_v0, 1 }
 0x285   : > { %1462 = vpush %v881_v6  ;;  %v896_v11 = vadd.f32 %v895_v2, %v894_v59 }
 0x286   : > { %v1009_v12 = vrot.slane %v1008_v7, 2  ;;  %v1050_v15 = vadd.f32 %v1049_v5, %v1048_v63  ;;  %v924_v10 = vrot.slane %v923_v8, 1  ;;  %v1002_v18 = vadd.f32 %v1001_v9, %v1000_v0 }
 0x287   : > { %1464 = vpush %v896_v11 }
 0x288   : > { %v1010_v20 = vmax.f32 %v1008_v7, %v1009_v12  ;;  %1466 = vpush %v910_v16  ;;  %v925_v21 = vadd.f32 %v924_v10, %v923_v8  ;;  %v1051_v22 = vrot.slane %v1050_v15, 1 }
 0x28a   : > { %1468 = vpush %v925_v21  ;;  %v1011_v51 = vrot.slane %v1010_v20, 1  ;;  %v1052_v23 = vadd.f32 %v1051_v22, %v1050_v15 }
 0x28b   : > { %1470 = vpush %v1002_v18 }
 0x28c   : > { %v1012_v24 = vmax.f32 %v1010_v20, %v1011_v51 }
 0x28e   : > { %1472 = vpush %v1012_v24 }
 0x28f   : > { %1474 = vpush %v1052_v23 }
 0x2a7   : > { %s1433_s23 = spop %1432 }
 0x2a8   : > { %s1435_s30 = spop %1434 }
 0x2a9   : > { %s1437_s10 = spop %1436 }
 0x2aa   : > { %s1439_s3 = spop %1438 }
 0x2ab   : > { %s1441_s1 = spop %1440  ;;  %s703_s16 = sadd.f32 %s1439_s3, %s1431_s7 }
 0x2ac   : > { %s1443_s6 = spop %1442  ;;  %s718_s12 = sadd.f32 %s1441_s1, %s1433_s23 }
 0x2ad   : > { %s1445_s4 = spop %1444  ;;  %s732_s24 = sadd.f32 %s1443_s6, %s1435_s30 }
 0x2ae   : > { %s1447_s19 = spop %1446  ;;  %s747_s5 = sadd.f32 %s1445_s4, %s1437_s10 }
 0x2af   : > { %s1449_s11 = spop %1448  ;;  %s763_s27 = sadd.f32 %s1447_s19, %s703_s16 }
 0x2b0   : > { %s1451_s9 = spop %1450  ;;  %s778_s25 = sadd.f32 %s1449_s11, %s718_s12 }
 0x2b1   : > { %s1453_s29 = spop %1452  ;;  %s792_s2 = sadd.f32 %s1451_s9, %s732_s24 }
 0x2b2   : > { %s1455_s18 = spop %1454  ;;  %s807_s20 = sadd.f32 %s1453_s29, %s747_s5 }
 0x2b3   : > { %s1457_s0 = spop %1456  ;;  %s823_s28 = sadd.f32 %s1455_s18, %s763_s27 }
 0x2b4   : > { %s1459_s22 = spop %1458  ;;  %s838_s21 = sadd.f32 %s1457_s0, %s778_s25 }
 0x2b5   : > { %s1461_s15 = spop %1460  ;;  %s852_s3 = sadd.f32 %s1459_s22, %s792_s2 }
 0x2b6   : > { %s1463_s7 = spop %1462  ;;  %s867_s1 = sadd.f32 %s1461_s15, %s807_s20 }
 0x2b7   : > { %s883_s30 = sadd.f32 %s1463_s7, %s823_s28  ;;  %s612_s28 = scalar_lea.vmem [#allocation15], %s2708_s13 }
 0x2b8   : > { %s1465_s23 = spop %1464  ;;  %s1114_s20 = sshll.u32 %s612_s28, 4  ;;  %s2920_s20 = int_to_ptr.vmem [resolvable:$true] %s1114_s20 }
 0x2b9   : > { %s1467_s10 = spop %1466  ;;  %s898_s6 = sadd.f32 %s1465_s23, %s838_s21  ;;  %v1055_v13 = vstv %s883_s30 }
 0x2ba   : > { %s912_s19 = sadd.f32 %s1467_s10, %s852_s3  ;;  %v1056_v27 = vsel %vm973_vm1, %v1055_v13, 0.0  ;;  %s3195_s21 = sshll.u32 %s2874_s8, 7 }
 0x2bb   : > { %s1469_s4 = spop %1468  ;;  %v1062_v25 = vstv %s898_s6  ;;  %s3197_s22 = smov %s3196_s14 }
 0x2bc   : > { %s927_s16 = sadd.f32 %s1469_s4, %s867_s1  ;;  %s1471_s12 = spop %1470  ;;  %v1063_v31 = vsel %vm1061_vm11, %v1062_v25, 0.0 }
 0x2bd   : > { %v1066_v30 = vstv %s1471_s12  ;;  %s2918_s24 = scalar_lea.hbm %s3196_s14, %s3195_s21  ;;  %s1084_s9 = scalar_lea.sflag [#allocation16], %s2690_s17 }
 0x2be   : > { %s3234_s16 = smov (!%p928_p11, %s927_s16), 0.0  ;;  %v1067_v34 = vsel %vm1065_vm12, %v1066_v30, 0.0  ;;  %s1905_s5 = scalar_lea.vmem %s2920_s20, 128 }
 0x2bf   : > { %s930_s11 = sadd.f32 %s3234_s16, %s912_s19  ;;  %s1473_s0 = spop %1472 }
 0x2c0   : > { %s1475_s25 = spop %1474  ;;  %v1070_v33 = vstv %s1473_s0  ;;  %p1906_p2 = scmp.ne.s32.totalorder %s2920_s20, %s1905_s5 }
 0x2c1   : > { %v1058_v26 = vstv %s930_s11  ;;  %s3236_s25 = smov (!%p1029_p7, %s1475_s25), 0.0  ;;  %v1071_v36 = vsel %vm1069_vm13, %v1070_v33, 0.0  ;;  %s2111_s13 = smov [#allocation15]  }
 0x2c2   : > { %v1059_v28 = vsel %vm1057_vm10, %v1058_v26, 0.0  ;;  %v1074_v35 = vstv %s3236_s25  ;;  %p1907_p6 = pnand %p1906_p2, %p3194_p8  ;;  %s1909_s29 = sshll.u32 %s2111_s13, 4  ;;  %s1910_s29 = int_to_ptr.vmem [resolvable:$false] %s1909_s29 }
 0x2c3   : > { %v1060_v29 = vadd.f32 %v1059_v28, %v1056_v27  ;;  %v1075_v38 = vsel %vm1073_vm14, %v1074_v35, 0.0  ;;  %s1911_s8 = scalar_lea.vmem %s1910_s29, 256  ;;  %p1912_p13 = scmp.lt.s32.totalorder %s2920_s20, %s1910_s29 }
 0x2c4   : > { %p1908_p9 = pneg %p1907_p6  ;;  %p1913_p10 = scmp.lt.s32.totalorder %s1911_s8, %s1905_s5 }
 0x2c5   : > { %v1064_v32 = vadd.f32 %v1063_v31, %v1060_v29 }
 0x2c6   : > { %p1914_p12 = por %p1913_p10, %p1912_p13 }
 0x2c7   : > { %v1068_v14 = vadd.f32 %v1067_v34, %v1064_v32 }
 0x2c8   : > { %p1915_p4 = pnand %p1914_p12, %p1908_p9 }
 0x2c9   : > { %v1072_v37 = vadd.f32 %v1071_v36, %v1068_v14 }
 0x2cb   : > { %v1076_v39 = vadd.f32 %v1075_v38, %v1072_v37 }
 0x2cd   : > { %1077 = vst [vmem:[%s612_s28] sm:$0xff] %v1076_v39 }
 0x2ce   : > { %1918 = shalt.err (!%p1915_p4)
}
 0x2cf   : > { %s1919_s17 = scalar_lea.hbm %s2918_s24, 128  ;;  %s1923_s7 = scalar_lea.hbm %s3197_s22, 1024 }
 0x2d0   : > { %p1920_p1 = scmp.ne.s32.totalorder %s2918_s24, %s1919_s17  ;;  %p1924_p3 = scmp.lt.u32.totalorder %s2918_s24, %s3197_s22 }
 0x2d1   : > { %p1925_p11 = scmp.lt.u32.totalorder %s1923_s7, %s1919_s17  ;;  %p1927_p2 = scmp.lt.u32.totalorder %s1919_s17, %s2918_s24 }
 0x2d2   : > { %p1921_p0 = pnand %p1920_p1, %p3194_p8 }
 0x2d3   : > { %p1926_p7 = por %p1925_p11, %p1924_p3 }
 0x2d4   : > { %p1922_p5 = pneg %p1921_p0 }
 0x2d5   : > { %p1928_p6 = por %p1927_p2, %p1926_p7 }
 0x2d7   : > { %p1929_p9 = pnand %p1928_p6, %p1922_p5 }
 0x2d9   : > { %1932 = shalt.err (!%p1929_p9)
}
 0x2da   : > { %1491 = dma.vmem_to_hbm [thread:$0]  (%p3194_p8), %s2920_s20, 128, %s2918_s24, %s1084_s9  }
 0x2db PF: > { %s3198_s1 = sld [smem:[#allocation38_spill]]  ;;  %s3199_s30 = sld [smem:[#allocation31_spill]] }
 0x2dc   : > { %s3200_s10 = sld [smem:[#allocation43_spill]] }
 0x2e1   : > { %p1524_p13 = scmp.ge.s32.totalorder %s3198_s1, 2  ;;  %s1126_s6 = sand.u32 1, %s3199_s30  }
 0x2e2   : > { %p3201_p10 = scmp.ne.s32.totalorder %s3200_s10, 0  ;;  %s1127_s4 = scalar_lea.sflag [#allocation4], %s1126_s6 }
 0x2e4   : > { %p1517_p12 = pnand %p1524_p13, %p3201_p10 }
 0x2e6   : > { %2022 = dma.done.wait (!%p1517_p12), %s1127_s4, 128  }
 0x2e7   : > { %2024 = vsyncadd (!%p1517_p12), %s1127_s4, 4294967168  ;;  %s1136_s16 = scalar_lea.sflag [#allocation16], %s1126_s6 }
 0x2e8   : > { %2026 = dma.done.wait (!%p1517_p12), %s1136_s16, 128  }
 0x2e9   : > { %2028 = vsyncadd (!%p1517_p12), %s1136_s16, 4294967168  ;;  %s37_s21 = sadd.s32 1, %s3198_s1   ;;  %s3203_s27 = sld [smem:[#allocation24_spill]] }
 0x2ea   : > { %p2949_p4 = scmp.ge.s32.totalorder %s37_s21, 10   ;;  %s3204_s28 = sld [smem:[#allocation25_spill]] }
 0x2eb   : > { %s3205_s29 = sld [smem:[#allocation51_spill]]  ;;  %s3206_s30 = sld [smem:[#allocation27_spill]] }
 0x2ec   : > { %s3207_s9 = sld [smem:[#allocation28_spill]]  ;;  %s3208_s10 = sld [smem:[#allocation53_spill]] }
 0x2ed   : > { %s3209_s11 = sld [smem:[#allocation29_spill]]  ;;  %s3210_s12 = sld [smem:[#allocation30_spill]] }
 0x2ee   : > { %s3211_s13 = sld [smem:[#allocation50_spill]]  ;;  %s3212_s14 = sld [smem:[#allocation32_spill]] }
 0x2ef   : > { %s3213_s15 = sld [smem:[#allocation33_spill]]  ;;  %s3214_s16 = sld [smem:[#allocation49_spill]] }
 0x2f0   : > { %s3215_s17 = sld [smem:[#allocation36_spill]]  ;;  %s3216_s18 = sld [smem:[#allocation37_spill]] }
 0x2f1   : > { %s3217_s19 = sld [smem:[#allocation40_spill]]  ;;  %s3218_s20 = sld [smem:[#allocation48_spill]] }
 0x2f2   :  { %36 = sbr.rel (!%p2949_p4) target bundleno = 30 (0x1e), region = 195 }
 0x2f9   :  { %1141 = vsyncpa [#allocation3], 1 }
 0x2fa   :  { %1143 = vsyncpa [#allocation3 + $0x1], 1 }
 0x2fb   :  { %1144 = vsyncpa [#allocation6], 1 }
 0x2fc   :  { %1146 = vsyncpa [#allocation6 + $0x1], 1 }
 0x2fd   :  { %1147 = vsyncpa [#allocation9], 1 }
 0x2fe   :  { %1149 = vsyncpa [#allocation9 + $0x1], 1 }
 0x2ff   :  { %1150 = vsyncpa [#allocation12], 1 }
 0x300   :  { %1152 = vsyncpa [#allocation12 + $0x1], 1 }
 0x301   :  { %1153 = vsyncpa [#allocation4], 1 }
 0x302   :  { %1155 = vsyncpa [#allocation4 + $0x1], 1 }
 0x303   :  { %1156 = vsyncpa [#allocation16], 1 }
 0x304   :  { %1158 = vsyncpa [#allocation16 + $0x1], 1 }

</bundles_post_ra>
